<compile_context>
chip_gen: v5e
topology: v5e:2x2
jax: 0.10.0
libtpu: 0.0.40
codegen_flags: <defaults>
</compile_context>

<pallas_src>
import math
import functools

import jax
import jax.numpy as jnp
from jax.experimental import pallas as pl
from jax.experimental.pallas import tpu as pltpu  # noqa: F401  (TPU backend)

# ----------------------------- config (small) -------------------------------
B = 2            # batch (number of prompts)
L = 8            # context length (seq)
D = 32           # transformer width
N_HEADS = 4      # attention heads
DEPTH = 2        # transformer layers
PROJ = 16        # text_projection output dim
DTYPE = jnp.float32
WEIGHT_DTYPE = jnp.bfloat16   # matmul weights (f32 accumulation in-kernel)


# --------------------------- fused Pallas kernel -----------------------------
def _text_encoder_kernel(
    x_ref,        # (B*L, D)  f32   prompts (flattened batch*seq)
    pos_ref,      # (L, D)    f32   positional embedding
    sel_ref,      # (B, B*L)  f32   one-hot EOT row-selection matrix
    ln1_g_ref, ln1_b_ref,           # (DEPTH, 1, D)       f32
    w_in_ref, b_in_ref,             # (DEPTH, D, 3D) bf16 / (DEPTH, 1, 3D) f32
    w_out_ref, b_out_ref,           # (DEPTH, D, D)  bf16 / (DEPTH, 1, D)  f32
    ln2_g_ref, ln2_b_ref,           # (DEPTH, 1, D)       f32
    w_fc_ref, b_fc_ref,             # (DEPTH, D, 4D) bf16 / (DEPTH, 1, 4D) f32
    w_proj_ref, b_proj_ref,         # (DEPTH, 4D, D) bf16 / (DEPTH, 1, D)  f32
    lnf_g_ref, lnf_b_ref,           # (1, D) f32
    tproj_ref,    # (D, PROJ) bf16
    out_ref,      # (B, PROJ) f32
    *, n_heads,
):
    seq, d = pos_ref.shape
    n_tok = x_ref.shape[0]
    batch = n_tok // seq
    depth = w_in_ref.shape[0]
    dh = d // n_heads
    scale = 1.0 / math.sqrt(dh)

    def layer_norm(x, g, b):
        mu = jnp.mean(x, axis=-1, keepdims=True)
        var = jnp.mean((x - mu) ** 2, axis=-1, keepdims=True)
        return (x - mu) * jax.lax.rsqrt(var + 1e-5) * g + b

    def matmul(x, w):
        # bf16 operands, f32 accumulation: single-pass MXU on v6e/v7x.
        return jnp.dot(x.astype(jnp.bfloat16), w.astype(jnp.bfloat16),
                       preferred_element_type=jnp.float32)

    # Causal mask, built once and reused by every head / layer.
    row = jax.lax.broadcasted_iota(jnp.int32, (seq, seq), 0)
    col = jax.lax.broadcasted_iota(jnp.int32, (seq, seq), 1)
    causal = col <= row

    # x = prompts + positional_embedding  (broadcast pos over batch).
    pos = pos_ref[...]
    x = x_ref[...] + jnp.concatenate([pos] * batch, axis=0)      # (B*L, D) f32

    for layer in range(depth):
        # ---------------- multi-head causal self-attention ----------------
        y = layer_norm(x, ln1_g_ref[layer], ln1_b_ref[layer])
        qkv = matmul(y, w_in_ref[layer]) + b_in_ref[layer]        # (B*L, 3D)

        batch_rows = []
        for b in range(batch):            # static unroll: B*H tiny slices,
            r0 = b * seq                  # all resident in vregs
            heads = []
            for h in range(n_heads):
                c0 = h * dh
                q = qkv[r0:r0 + seq, c0:c0 + dh]                  # (L, Dh)
                k = qkv[r0:r0 + seq, d + c0:d + c0 + dh]
                v = qkv[r0:r0 + seq, 2 * d + c0:2 * d + c0 + dh]
                s = jnp.dot(q, k.T, preferred_element_type=jnp.float32) * scale
                s = jnp.where(causal, s, -jnp.inf)
                s = s - jnp.max(s, axis=-1, keepdims=True)
                p = jnp.exp(s)
                p = p * pl.reciprocal(jnp.sum(p, axis=-1, keepdims=True),
                                      approx=True)
                heads.append(jnp.dot(p, v, preferred_element_type=jnp.float32))
            batch_rows.append(jnp.concatenate(heads, axis=-1))    # (L, D)
        attn = jnp.concatenate(batch_rows, axis=0)                # (B*L, D)

        x = x + matmul(attn, w_out_ref[layer]) + b_out_ref[layer]

        # ---------------- MLP: Linear -> QuickGELU -> Linear ---------------
        y = layer_norm(x, ln2_g_ref[layer], ln2_b_ref[layer])
        hmid = matmul(y, w_fc_ref[layer]) + b_fc_ref[layer]       # (B*L, 4D)
        hmid = hmid * jax.nn.sigmoid(1.702 * hmid)                # QuickGELU
        x = x + matmul(hmid, w_proj_ref[layer]) + b_proj_ref[layer]

    # --------- ln_final, EOT gather (one-hot matmul), text_projection -------
    x = layer_norm(x, lnf_g_ref[...], lnf_b_ref[...])             # (B*L, D)
    x_eot = jnp.dot(sel_ref[...], x, preferred_element_type=jnp.float32)  # (B, D)
    out_ref[...] = matmul(x_eot, tproj_ref[...]).astype(out_ref.dtype)


# ------------------------------- wrapper -------------------------------------
def text_encoder_forward(prompts, tokenized_prompts, params):
    """prompts: (B, L, D) float32; tokenized_prompts: (B, L) int32."""
    b, seq, d = prompts.shape
    proj_dim = params["text_projection"].shape[1]

    x2 = prompts.reshape(b * seq, d)
    # EOT position = argmax of token ids (as in CLIP); build a one-hot
    # selection matrix so the gather happens in-kernel as a tiny matmul.
    eot = jnp.argmax(tokenized_prompts, axis=-1)                      # (B,)
    sel = jax.nn.one_hot(jnp.arange(b) * seq + eot, b * seq,
                         dtype=prompts.dtype)                         # (B, B*L)

    kern = functools.partial(_text_encoder_kernel, n_heads=N_HEADS)
    return pl.pallas_call(
        kern,
        out_shape=jax.ShapeDtypeStruct((b, proj_dim), prompts.dtype),
    )(
        x2, params["pos_emb"], sel,
        params["ln1_g"], params["ln1_b"],
        params["w_in"], params["b_in"],
        params["w_out"], params["b_out"],
        params["ln2_g"], params["ln2_b"],
        params["w_fc"], params["b_fc"],
        params["w_proj"], params["b_proj"],
        params["lnf_g"], params["lnf_b"],
        params["text_projection"],
    )


# --------------------------- pure-JAX reference -------------------------------
def text_encoder_reference(prompts, tokenized_prompts, params):
    b, seq, d = prompts.shape
    dh = d // N_HEADS

    def mm(a, w):
        return jnp.dot(a.astype(jnp.bfloat16), w,
                       preferred_element_type=jnp.float32)

    def ln(a, g, bb):
        mu = jnp.mean(a, axis=-1, keepdims=True)
        var = jnp.mean((a - mu) ** 2, axis=-1, keepdims=True)
        return (a - mu) * jax.lax.rsqrt(var + 1e-5) * g + bb

    mask = jnp.tril(jnp.ones((seq, seq), dtype=bool))
    x = prompts + params["pos_emb"][None]
    for layer in range(DEPTH):
        y = ln(x, params["ln1_g"][layer], params["ln1_b"][layer])
        qkv = mm(y.reshape(b * seq, d), params["w_in"][layer]) + params["b_in"][layer]
        qkv = qkv.reshape(b, seq, 3, N_HEADS, dh)
        q = qkv[:, :, 0].transpose(0, 2, 1, 3)
        k = qkv[:, :, 1].transpose(0, 2, 1, 3)
        v = qkv[:, :, 2].transpose(0, 2, 1, 3)
        s = jnp.einsum("bhqd,bhkd->bhqk", q, k) / math.sqrt(dh)
        s = jnp.where(mask, s, -jnp.inf)
        p = jax.nn.softmax(s, axis=-1)
        a = jnp.einsum("bhqk,bhkd->bhqd", p, v).transpose(0, 2, 1, 3)
        a = mm(a.reshape(b * seq, d), params["w_out"][layer]) + params["b_out"][layer]
        x = x + a.reshape(b, seq, d)

        y = ln(x, params["ln2_g"][layer], params["ln2_b"][layer])
        h = mm(y.reshape(b * seq, d), params["w_fc"][layer]) + params["b_fc"][layer]
        h = h * jax.nn.sigmoid(1.702 * h)
        h = mm(h, params["w_proj"][layer]) + params["b_proj"][layer]
        x = x + h.reshape(b, seq, d)

    x = ln(x, params["lnf_g"], params["lnf_b"])
    eot = jnp.argmax(tokenized_prompts, axis=-1)
    x_eot = x[jnp.arange(b), eot]
    return mm(x_eot, params["text_projection"])


# ------------------------------ param init -----------------------------------
def init_params(key):
    def nrm(k, shape, std=0.02, dtype=DTYPE):
        return (std * jax.random.normal(k, shape)).astype(dtype)

    keys = iter(jax.random.split(key, 2 + 4 * DEPTH))
    params = {
        "pos_emb": nrm(next(keys), (L, D), std=0.01),
        "lnf_g": jnp.ones((1, D), DTYPE),
        "lnf_b": jnp.zeros((1, D), DTYPE),
        "text_projection": nrm(next(keys), (D, PROJ), std=D ** -0.5,
                               dtype=WEIGHT_DTYPE),
    }
    blocks = []
    for _ in range(DEPTH):
        blocks.append(dict(
            ln1_g=jnp.ones((1, D), DTYPE), ln1_b=jnp.zeros((1, D), DTYPE),
            w_in=nrm(next(keys), (D, 3 * D), dtype=WEIGHT_DTYPE),
            b_in=jnp.zeros((1, 3 * D), DTYPE),
            w_out=nrm(next(keys), (D, D), dtype=WEIGHT_DTYPE),
            b_out=jnp.zeros((1, D), DTYPE),
            ln2_g=jnp.ones((1, D), DTYPE), ln2_b=jnp.zeros((1, D), DTYPE),
            w_fc=nrm(next(keys), (D, 4 * D), dtype=WEIGHT_DTYPE),
            b_fc=jnp.zeros((1, 4 * D), DTYPE),
            w_proj=nrm(next(keys), (4 * D, D), dtype=WEIGHT_DTYPE),
            b_proj=jnp.zeros((1, D), DTYPE),
        ))
    for name in blocks[0]:
        params[name] = jnp.stack([blk[name] for blk in blocks], axis=0)
    return params


# --------------------------------- main ---------------------------------------
if __name__ == "__main__":
    root = jax.random.PRNGKey(0)
    k_par, k_prompt, k_tok = jax.random.split(root, 3)

    params = init_params(k_par)
    prompts = (0.02 * jax.random.normal(k_prompt, (B, L, D))).astype(DTYPE)
    # token ids; argmax(-1) picks the "EOT" position (highest id), as in CLIP
    tokenized_prompts = jax.random.randint(k_tok, (B, L), 1, 1000, dtype=jnp.int32)

    fwd = jax.jit(text_encoder_forward)
    out = jax.block_until_ready(fwd(prompts, tokenized_prompts, params))

    assert out.shape == (B, PROJ) and out.dtype == DTYPE
    assert bool(jnp.all(jnp.isfinite(out)))

    ref = text_encoder_reference(prompts, tokenized_prompts, params)
    max_err = float(jnp.max(jnp.abs(out - ref)))
    assert max_err < 5e-2, f"mismatch vs reference: {max_err}"

    print("KERNEL_OK")
</pallas_src>

<mosaic_0001>
module attributes {stable_mosaic.version = 11 : i64} {
  func.func @_text_encoder_kernel(%arg0: memref<16x32xf32, #tpu.memory_space<vmem>>, %arg1: memref<8x32xf32, #tpu.memory_space<vmem>>, %arg2: memref<2x16xf32, #tpu.memory_space<vmem>>, %arg3: memref<2x1x32xf32, #tpu.memory_space<vmem>>, %arg4: memref<2x1x32xf32, #tpu.memory_space<vmem>>, %arg5: memref<2x32x96xbf16, #tpu.memory_space<vmem>>, %arg6: memref<2x1x96xf32, #tpu.memory_space<vmem>>, %arg7: memref<2x32x32xbf16, #tpu.memory_space<vmem>>, %arg8: memref<2x1x32xf32, #tpu.memory_space<vmem>>, %arg9: memref<2x1x32xf32, #tpu.memory_space<vmem>>, %arg10: memref<2x1x32xf32, #tpu.memory_space<vmem>>, %arg11: memref<2x32x128xbf16, #tpu.memory_space<vmem>>, %arg12: memref<2x1x128xf32, #tpu.memory_space<vmem>>, %arg13: memref<2x128x32xbf16, #tpu.memory_space<vmem>>, %arg14: memref<2x1x32xf32, #tpu.memory_space<vmem>>, %arg15: memref<1x32xf32, #tpu.memory_space<vmem>>, %arg16: memref<1x32xf32, #tpu.memory_space<vmem>>, %arg17: memref<32x16xbf16, #tpu.memory_space<vmem>>, %arg18: memref<2x16xf32, #tpu.memory_space<vmem>>) attributes {dimension_semantics = [], scalar_prefetch = 0 : i64, scratch_operands = 0 : i64, tpu.core_type = #tpu.core_type<tc>} {
    %0 = tpu.iota {dimensions = array<i32: 0>} : vector<8x8xi32>
    %1 = tpu.iota {dimensions = array<i32: 1>} : vector<8x8xi32>
    %2 = arith.cmpi sle, %1, %0 : vector<8x8xi32>
    %c0 = arith.constant 0 : index
    %c0_0 = arith.constant 0 : index
    %3 = vector.load %arg1[%c0, %c0_0] : memref<8x32xf32, #tpu.memory_space<vmem>>, vector<8x32xf32>
    %c0_1 = arith.constant 0 : index
    %c0_2 = arith.constant 0 : index
    %4 = vector.load %arg0[%c0_1, %c0_2] : memref<16x32xf32, #tpu.memory_space<vmem>>, vector<16x32xf32>
    %5 = tpu.concatenate %3, %3 in 0 : vector<8x32xf32>, vector<8x32xf32> -> vector<16x32xf32>
    %6 = arith.addf %4, %5 : vector<16x32xf32>
    %c0_3 = arith.constant 0 : index
    %c0_4 = arith.constant 0 : index
    %c0_5 = arith.constant 0 : index
    %7 = vector.load %arg3[%c0_3, %c0_4, %c0_5] : memref<2x1x32xf32, #tpu.memory_space<vmem>>, vector<1x1x32xf32>
    %8 = vector.shape_cast %7 : vector<1x1x32xf32> to vector<1x32xf32>
    %c0_6 = arith.constant 0 : index
    %c0_7 = arith.constant 0 : index
    %c0_8 = arith.constant 0 : index
    %9 = vector.load %arg4[%c0_6, %c0_7, %c0_8] : memref<2x1x32xf32, #tpu.memory_space<vmem>>, vector<1x1x32xf32>
    %10 = vector.shape_cast %9 : vector<1x1x32xf32> to vector<1x32xf32>
    %cst = arith.constant dense<0.000000e+00> : vector<16xf32>
    %11 = vector.multi_reduction <add>, %6, %cst [1] : vector<16x32xf32> to vector<16xf32>
    %12 = vector.shape_cast %11 : vector<16xf32> to vector<16x1xf32>
    %cst_9 = arith.constant 3.200000e+01 : f32
    %13 = vector.broadcast %cst_9 : f32 to vector<16x1xf32>
    %14 = arith.divf %12, %13 : vector<16x1xf32>
    %15 = vector.broadcast %14 : vector<16x1xf32> to vector<16x32xf32>
    %16 = arith.subf %6, %15 : vector<16x32xf32>
    %17 = arith.mulf %16, %16 : vector<16x32xf32>
    %cst_10 = arith.constant dense<0.000000e+00> : vector<16xf32>
    %18 = vector.multi_reduction <add>, %17, %cst_10 [1] : vector<16x32xf32> to vector<16xf32>
    %19 = vector.shape_cast %18 : vector<16xf32> to vector<16x1xf32>
    %cst_11 = arith.constant 3.200000e+01 : f32
    %20 = vector.broadcast %cst_11 : f32 to vector<16x1xf32>
    %21 = arith.divf %19, %20 : vector<16x1xf32>
    %22 = vector.broadcast %14 : vector<16x1xf32> to vector<16x32xf32>
    %23 = arith.subf %6, %22 : vector<16x32xf32>
    %cst_12 = arith.constant 9.99999974E-6 : f32
    %24 = vector.broadcast %cst_12 : f32 to vector<16x1xf32>
    %25 = arith.addf %21, %24 : vector<16x1xf32>
    %26 = math.rsqrt %25 : vector<16x1xf32>
    %27 = vector.broadcast %26 : vector<16x1xf32> to vector<16x32xf32>
    %28 = arith.mulf %23, %27 : vector<16x32xf32>
    %29 = vector.broadcast %8 : vector<1x32xf32> to vector<16x32xf32>
    %30 = arith.mulf %28, %29 : vector<16x32xf32>
    %31 = vector.broadcast %10 : vector<1x32xf32> to vector<16x32xf32>
    %32 = arith.addf %30, %31 : vector<16x32xf32>
    %c0_13 = arith.constant 0 : index
    %c0_14 = arith.constant 0 : index
    %c0_15 = arith.constant 0 : index
    %33 = vector.load %arg5[%c0_13, %c0_14, %c0_15] : memref<2x32x96xbf16, #tpu.memory_space<vmem>>, vector<1x32x96xbf16>
    %34 = vector.shape_cast %33 : vector<1x32x96xbf16> to vector<32x96xbf16>
    %35 = arith.truncf %32 : vector<16x32xf32> to vector<16x32xbf16>
    %cst_16 = arith.constant dense<0.000000e+00> : vector<16x96xf32>
    %36 = tpu.matmul %35, %34, %cst_16 {dimension_numbers = #tpu.dot_dimension_numbers<[1], [0], [0], [1], [0, 0, 1, 1], [], []>} : vector<16x32xbf16>, vector<32x96xbf16>, vector<16x96xf32> -> vector<16x96xf32>
    %c0_17 = arith.constant 0 : index
    %c0_18 = arith.constant 0 : index
    %c0_19 = arith.constant 0 : index
    %37 = vector.load %arg6[%c0_17, %c0_18, %c0_19] : memref<2x1x96xf32, #tpu.memory_space<vmem>>, vector<1x1x96xf32>
    %38 = vector.shape_cast %37 : vector<1x1x96xf32> to vector<1x96xf32>
    %39 = vector.broadcast %38 : vector<1x96xf32> to vector<16x96xf32>
    %40 = arith.addf %36, %39 : vector<16x96xf32>
    %41 = vector.extract_strided_slice %40 {offsets = [0, 0], sizes = [8, 8], strides = [1, 1]} : vector<16x96xf32> to vector<8x8xf32>
    %42 = vector.extract_strided_slice %40 {offsets = [0, 32], sizes = [8, 8], strides = [1, 1]} : vector<16x96xf32> to vector<8x8xf32>
    %43 = vector.extract_strided_slice %40 {offsets = [0, 64], sizes = [8, 8], strides = [1, 1]} : vector<16x96xf32> to vector<8x8xf32>
    %44 = tpu.transpose %42, [1, 0] : vector<8x8xf32> -> vector<8x8xf32>
    %cst_20 = arith.constant dense<0.000000e+00> : vector<8x8xf32>
    %45 = tpu.matmul %41, %44, %cst_20 {dimension_numbers = #tpu.dot_dimension_numbers<[1], [0], [0], [1], [0, 0, 1, 1], [], []>} : vector<8x8xf32>, vector<8x8xf32>, vector<8x8xf32> -> vector<8x8xf32>
    %cst_21 = arith.constant 0.353553385 : f32
    %46 = vector.broadcast %cst_21 : f32 to vector<8x8xf32>
    %47 = arith.mulf %45, %46 : vector<8x8xf32>
    %cst_22 = arith.constant 0xFF800000 : f32
    %48 = vector.broadcast %cst_22 : f32 to vector<8x8xf32>
    %49 = arith.select %2, %47, %48 : vector<8x8xi1>, vector<8x8xf32>
    %cst_23 = arith.constant dense<0xFF800000> : vector<8xf32>
    %50 = vector.multi_reduction <maximumf>, %49, %cst_23 [1] : vector<8x8xf32> to vector<8xf32>
    %51 = vector.shape_cast %50 : vector<8xf32> to vector<8x1xf32>
    %52 = vector.broadcast %51 : vector<8x1xf32> to vector<8x8xf32>
    %53 = arith.subf %49, %52 : vector<8x8xf32>
    %54 = math.exp %53 : vector<8x8xf32>
    %cst_24 = arith.constant dense<0.000000e+00> : vector<8xf32>
    %55 = vector.multi_reduction <add>, %54, %cst_24 [1] : vector<8x8xf32> to vector<8xf32>
    %56 = vector.shape_cast %55 : vector<8xf32> to vector<8x1xf32>
    %57 = tpu.reciprocal %56 {approx = true} : vector<8x1xf32> -> vector<8x1xf32>
    %58 = vector.broadcast %57 : vector<8x1xf32> to vector<8x8xf32>
    %59 = arith.mulf %54, %58 : vector<8x8xf32>
    %cst_25 = arith.constant dense<0.000000e+00> : vector<8x8xf32>
    %60 = tpu.matmul %59, %43, %cst_25 {dimension_numbers = #tpu.dot_dimension_numbers<[1], [0], [0], [1], [0, 0, 1, 1], [], []>} : vector<8x8xf32>, vector<8x8xf32>, vector<8x8xf32> -> vector<8x8xf32>
    %61 = vector.extract_strided_slice %40 {offsets = [0, 8], sizes = [8, 8], strides = [1, 1]} : vector<16x96xf32> to vector<8x8xf32>
    %62 = vector.extract_strided_slice %40 {offsets = [0, 40], sizes = [8, 8], strides = [1, 1]} : vector<16x96xf32> to vector<8x8xf32>
    %63 = vector.extract_strided_slice %40 {offsets = [0, 72], sizes = [8, 8], strides = [1, 1]} : vector<16x96xf32> to vector<8x8xf32>
    %64 = tpu.transpose %62, [1, 0] : vector<8x8xf32> -> vector<8x8xf32>
    %cst_26 = arith.constant dense<0.000000e+00> : vector<8x8xf32>
    %65 = tpu.matmul %61, %64, %cst_26 {dimension_numbers = #tpu.dot_dimension_numbers<[1], [0], [0], [1], [0, 0, 1, 1], [], []>} : vector<8x8xf32>, vector<8x8xf32>, vector<8x8xf32> -> vector<8x8xf32>
    %cst_27 = arith.constant 0.353553385 : f32
    %66 = vector.broadcast %cst_27 : f32 to vector<8x8xf32>
    %67 = arith.mulf %65, %66 : vector<8x8xf32>
    %cst_28 = arith.constant 0xFF800000 : f32
    %68 = vector.broadcast %cst_28 : f32 to vector<8x8xf32>
    %69 = arith.select %2, %67, %68 : vector<8x8xi1>, vector<8x8xf32>
    %cst_29 = arith.constant dense<0xFF800000> : vector<8xf32>
    %70 = vector.multi_reduction <maximumf>, %69, %cst_29 [1] : vector<8x8xf32> to vector<8xf32>
    %71 = vector.shape_cast %70 : vector<8xf32> to vector<8x1xf32>
    %72 = vector.broadcast %71 : vector<8x1xf32> to vector<8x8xf32>
    %73 = arith.subf %69, %72 : vector<8x8xf32>
    %74 = math.exp %73 : vector<8x8xf32>
    %cst_30 = arith.constant dense<0.000000e+00> : vector<8xf32>
    %75 = vector.multi_reduction <add>, %74, %cst_30 [1] : vector<8x8xf32> to vector<8xf32>
    %76 = vector.shape_cast %75 : vector<8xf32> to vector<8x1xf32>
    %77 = tpu.reciprocal %76 {approx = true} : vector<8x1xf32> -> vector<8x1xf32>
    %78 = vector.broadcast %77 : vector<8x1xf32> to vector<8x8xf32>
    %79 = arith.mulf %74, %78 : vector<8x8xf32>
    %cst_31 = arith.constant dense<0.000000e+00> : vector<8x8xf32>
    %80 = tpu.matmul %79, %63, %cst_31 {dimension_numbers = #tpu.dot_dimension_numbers<[1], [0], [0], [1], [0, 0, 1, 1], [], []>} : vector<8x8xf32>, vector<8x8xf32>, vector<8x8xf32> -> vector<8x8xf32>
    %81 = vector.extract_strided_slice %40 {offsets = [0, 16], sizes = [8, 8], strides = [1, 1]} : vector<16x96xf32> to vector<8x8xf32>
    %82 = vector.extract_strided_slice %40 {offsets = [0, 48], sizes = [8, 8], strides = [1, 1]} : vector<16x96xf32> to vector<8x8xf32>
    %83 = vector.extract_strided_slice %40 {offsets = [0, 80], sizes = [8, 8], strides = [1, 1]} : vector<16x96xf32> to vector<8x8xf32>
    %84 = tpu.transpose %82, [1, 0] : vector<8x8xf32> -> vector<8x8xf32>
    %cst_32 = arith.constant dense<0.000000e+00> : vector<8x8xf32>
    %85 = tpu.matmul %81, %84, %cst_32 {dimension_numbers = #tpu.dot_dimension_numbers<[1], [0], [0], [1], [0, 0, 1, 1], [], []>} : vector<8x8xf32>, vector<8x8xf32>, vector<8x8xf32> -> vector<8x8xf32>
    %cst_33 = arith.constant 0.353553385 : f32
    %86 = vector.broadcast %cst_33 : f32 to vector<8x8xf32>
    %87 = arith.mulf %85, %86 : vector<8x8xf32>
    %cst_34 = arith.constant 0xFF800000 : f32
    %88 = vector.broadcast %cst_34 : f32 to vector<8x8xf32>
    %89 = arith.select %2, %87, %88 : vector<8x8xi1>, vector<8x8xf32>
    %cst_35 = arith.constant dense<0xFF800000> : vector<8xf32>
    %90 = vector.multi_reduction <maximumf>, %89, %cst_35 [1] : vector<8x8xf32> to vector<8xf32>
    %91 = vector.shape_cast %90 : vector<8xf32> to vector<8x1xf32>
    %92 = vector.broadcast %91 : vector<8x1xf32> to vector<8x8xf32>
    %93 = arith.subf %89, %92 : vector<8x8xf32>
    %94 = math.exp %93 : vector<8x8xf32>
    %cst_36 = arith.constant dense<0.000000e+00> : vector<8xf32>
    %95 = vector.multi_reduction <add>, %94, %cst_36 [1] : vector<8x8xf32> to vector<8xf32>
    %96 = vector.shape_cast %95 : vector<8xf32> to vector<8x1xf32>
    %97 = tpu.reciprocal %96 {approx = true} : vector<8x1xf32> -> vector<8x1xf32>
    %98 = vector.broadcast %97 : vector<8x1xf32> to vector<8x8xf32>
    %99 = arith.mulf %94, %98 : vector<8x8xf32>
    %cst_37 = arith.constant dense<0.000000e+00> : vector<8x8xf32>
    %100 = tpu.matmul %99, %83, %cst_37 {dimension_numbers = #tpu.dot_dimension_numbers<[1], [0], [0], [1], [0, 0, 1, 1], [], []>} : vector<8x8xf32>, vector<8x8xf32>, vector<8x8xf32> -> vector<8x8xf32>
    %101 = vector.extract_strided_slice %40 {offsets = [0, 24], sizes = [8, 8], strides = [1, 1]} : vector<16x96xf32> to vector<8x8xf32>
    %102 = vector.extract_strided_slice %40 {offsets = [0, 56], sizes = [8, 8], strides = [1, 1]} : vector<16x96xf32> to vector<8x8xf32>
    %103 = vector.extract_strided_slice %40 {offsets = [0, 88], sizes = [8, 8], strides = [1, 1]} : vector<16x96xf32> to vector<8x8xf32>
    %104 = tpu.transpose %102, [1, 0] : vector<8x8xf32> -> vector<8x8xf32>
    %cst_38 = arith.constant dense<0.000000e+00> : vector<8x8xf32>
    %105 = tpu.matmul %101, %104, %cst_38 {dimension_numbers = #tpu.dot_dimension_numbers<[1], [0], [0], [1], [0, 0, 1, 1], [], []>} : vector<8x8xf32>, vector<8x8xf32>, vector<8x8xf32> -> vector<8x8xf32>
    %cst_39 = arith.constant 0.353553385 : f32
    %106 = vector.broadcast %cst_39 : f32 to vector<8x8xf32>
    %107 = arith.mulf %105, %106 : vector<8x8xf32>
    %cst_40 = arith.constant 0xFF800000 : f32
    %108 = vector.broadcast %cst_40 : f32 to vector<8x8xf32>
    %109 = arith.select %2, %107, %108 : vector<8x8xi1>, vector<8x8xf32>
    %cst_41 = arith.constant dense<0xFF800000> : vector<8xf32>
    %110 = vector.multi_reduction <maximumf>, %109, %cst_41 [1] : vector<8x8xf32> to vector<8xf32>
    %111 = vector.shape_cast %110 : vector<8xf32> to vector<8x1xf32>
    %112 = vector.broadcast %111 : vector<8x1xf32> to vector<8x8xf32>
    %113 = arith.subf %109, %112 : vector<8x8xf32>
    %114 = math.exp %113 : vector<8x8xf32>
    %cst_42 = arith.constant dense<0.000000e+00> : vector<8xf32>
    %115 = vector.multi_reduction <add>, %114, %cst_42 [1] : vector<8x8xf32> to vector<8xf32>
    %116 = vector.shape_cast %115 : vector<8xf32> to vector<8x1xf32>
    %117 = tpu.reciprocal %116 {approx = true} : vector<8x1xf32> -> vector<8x1xf32>
    %118 = vector.broadcast %117 : vector<8x1xf32> to vector<8x8xf32>
    %119 = arith.mulf %114, %118 : vector<8x8xf32>
    %cst_43 = arith.constant dense<0.000000e+00> : vector<8x8xf32>
    %120 = tpu.matmul %119, %103, %cst_43 {dimension_numbers = #tpu.dot_dimension_numbers<[1], [0], [0], [1], [0, 0, 1, 1], [], []>} : vector<8x8xf32>, vector<8x8xf32>, vector<8x8xf32> -> vector<8x8xf32>
    %121 = tpu.concatenate %60, %80, %100, %120 in 1 : vector<8x8xf32>, vector<8x8xf32>, vector<8x8xf32>, vector<8x8xf32> -> vector<8x32xf32>
    %122 = vector.extract_strided_slice %40 {offsets = [8, 0], sizes = [8, 8], strides = [1, 1]} : vector<16x96xf32> to vector<8x8xf32>
    %123 = vector.extract_strided_slice %40 {offsets = [8, 32], sizes = [8, 8], strides = [1, 1]} : vector<16x96xf32> to vector<8x8xf32>
    %124 = vector.extract_strided_slice %40 {offsets = [8, 64], sizes = [8, 8], strides = [1, 1]} : vector<16x96xf32> to vector<8x8xf32>
    %125 = tpu.transpose %123, [1, 0] : vector<8x8xf32> -> vector<8x8xf32>
    %cst_44 = arith.constant dense<0.000000e+00> : vector<8x8xf32>
    %126 = tpu.matmul %122, %125, %cst_44 {dimension_numbers = #tpu.dot_dimension_numbers<[1], [0], [0], [1], [0, 0, 1, 1], [], []>} : vector<8x8xf32>, vector<8x8xf32>, vector<8x8xf32> -> vector<8x8xf32>
    %cst_45 = arith.constant 0.353553385 : f32
    %127 = vector.broadcast %cst_45 : f32 to vector<8x8xf32>
    %128 = arith.mulf %126, %127 : vector<8x8xf32>
    %cst_46 = arith.constant 0xFF800000 : f32
    %129 = vector.broadcast %cst_46 : f32 to vector<8x8xf32>
    %130 = arith.select %2, %128, %129 : vector<8x8xi1>, vector<8x8xf32>
    %cst_47 = arith.constant dense<0xFF800000> : vector<8xf32>
    %131 = vector.multi_reduction <maximumf>, %130, %cst_47 [1] : vector<8x8xf32> to vector<8xf32>
    %132 = vector.shape_cast %131 : vector<8xf32> to vector<8x1xf32>
    %133 = vector.broadcast %132 : vector<8x1xf32> to vector<8x8xf32>
    %134 = arith.subf %130, %133 : vector<8x8xf32>
    %135 = math.exp %134 : vector<8x8xf32>
    %cst_48 = arith.constant dense<0.000000e+00> : vector<8xf32>
    %136 = vector.multi_reduction <add>, %135, %cst_48 [1] : vector<8x8xf32> to vector<8xf32>
    %137 = vector.shape_cast %136 : vector<8xf32> to vector<8x1xf32>
    %138 = tpu.reciprocal %137 {approx = true} : vector<8x1xf32> -> vector<8x1xf32>
    %139 = vector.broadcast %138 : vector<8x1xf32> to vector<8x8xf32>
    %140 = arith.mulf %135, %139 : vector<8x8xf32>
    %cst_49 = arith.constant dense<0.000000e+00> : vector<8x8xf32>
    %141 = tpu.matmul %140, %124, %cst_49 {dimension_numbers = #tpu.dot_dimension_numbers<[1], [0], [0], [1], [0, 0, 1, 1], [], []>} : vector<8x8xf32>, vector<8x8xf32>, vector<8x8xf32> -> vector<8x8xf32>
    %142 = vector.extract_strided_slice %40 {offsets = [8, 8], sizes = [8, 8], strides = [1, 1]} : vector<16x96xf32> to vector<8x8xf32>
    %143 = vector.extract_strided_slice %40 {offsets = [8, 40], sizes = [8, 8], strides = [1, 1]} : vector<16x96xf32> to vector<8x8xf32>
    %144 = vector.extract_strided_slice %40 {offsets = [8, 72], sizes = [8, 8], strides = [1, 1]} : vector<16x96xf32> to vector<8x8xf32>
    %145 = tpu.transpose %143, [1, 0] : vector<8x8xf32> -> vector<8x8xf32>
    %cst_50 = arith.constant dense<0.000000e+00> : vector<8x8xf32>
    %146 = tpu.matmul %142, %145, %cst_50 {dimension_numbers = #tpu.dot_dimension_numbers<[1], [0], [0], [1], [0, 0, 1, 1], [], []>} : vector<8x8xf32>, vector<8x8xf32>, vector<8x8xf32> -> vector<8x8xf32>
    %cst_51 = arith.constant 0.353553385 : f32
    %147 = vector.broadcast %cst_51 : f32 to vector<8x8xf32>
    %148 = arith.mulf %146, %147 : vector<8x8xf32>
    %cst_52 = arith.constant 0xFF800000 : f32
    %149 = vector.broadcast %cst_52 : f32 to vector<8x8xf32>
    %150 = arith.select %2, %148, %149 : vector<8x8xi1>, vector<8x8xf32>
    %cst_53 = arith.constant dense<0xFF800000> : vector<8xf32>
    %151 = vector.multi_reduction <maximumf>, %150, %cst_53 [1] : vector<8x8xf32> to vector<8xf32>
    %152 = vector.shape_cast %151 : vector<8xf32> to vector<8x1xf32>
    %153 = vector.broadcast %152 : vector<8x1xf32> to vector<8x8xf32>
    %154 = arith.subf %150, %153 : vector<8x8xf32>
    %155 = math.exp %154 : vector<8x8xf32>
    %cst_54 = arith.constant dense<0.000000e+00> : vector<8xf32>
    %156 = vector.multi_reduction <add>, %155, %cst_54 [1] : vector<8x8xf32> to vector<8xf32>
    %157 = vector.shape_cast %156 : vector<8xf32> to vector<8x1xf32>
    %158 = tpu.reciprocal %157 {approx = true} : vector<8x1xf32> -> vector<8x1xf32>
    %159 = vector.broadcast %158 : vector<8x1xf32> to vector<8x8xf32>
    %160 = arith.mulf %155, %159 : vector<8x8xf32>
    %cst_55 = arith.constant dense<0.000000e+00> : vector<8x8xf32>
    %161 = tpu.matmul %160, %144, %cst_55 {dimension_numbers = #tpu.dot_dimension_numbers<[1], [0], [0], [1], [0, 0, 1, 1], [], []>} : vector<8x8xf32>, vector<8x8xf32>, vector<8x8xf32> -> vector<8x8xf32>
    %162 = vector.extract_strided_slice %40 {offsets = [8, 16], sizes = [8, 8], strides = [1, 1]} : vector<16x96xf32> to vector<8x8xf32>
    %163 = vector.extract_strided_slice %40 {offsets = [8, 48], sizes = [8, 8], strides = [1, 1]} : vector<16x96xf32> to vector<8x8xf32>
    %164 = vector.extract_strided_slice %40 {offsets = [8, 80], sizes = [8, 8], strides = [1, 1]} : vector<16x96xf32> to vector<8x8xf32>
    %165 = tpu.transpose %163, [1, 0] : vector<8x8xf32> -> vector<8x8xf32>
    %cst_56 = arith.constant dense<0.000000e+00> : vector<8x8xf32>
    %166 = tpu.matmul %162, %165, %cst_56 {dimension_numbers = #tpu.dot_dimension_numbers<[1], [0], [0], [1], [0, 0, 1, 1], [], []>} : vector<8x8xf32>, vector<8x8xf32>, vector<8x8xf32> -> vector<8x8xf32>
    %cst_57 = arith.constant 0.353553385 : f32
    %167 = vector.broadcast %cst_57 : f32 to vector<8x8xf32>
    %168 = arith.mulf %166, %167 : vector<8x8xf32>
    %cst_58 = arith.constant 0xFF800000 : f32
    %169 = vector.broadcast %cst_58 : f32 to vector<8x8xf32>
    %170 = arith.select %2, %168, %169 : vector<8x8xi1>, vector<8x8xf32>
    %cst_59 = arith.constant dense<0xFF800000> : vector<8xf32>
    %171 = vector.multi_reduction <maximumf>, %170, %cst_59 [1] : vector<8x8xf32> to vector<8xf32>
    %172 = vector.shape_cast %171 : vector<8xf32> to vector<8x1xf32>
    %173 = vector.broadcast %172 : vector<8x1xf32> to vector<8x8xf32>
    %174 = arith.subf %170, %173 : vector<8x8xf32>
    %175 = math.exp %174 : vector<8x8xf32>
    %cst_60 = arith.constant dense<0.000000e+00> : vector<8xf32>
    %176 = vector.multi_reduction <add>, %175, %cst_60 [1] : vector<8x8xf32> to vector<8xf32>
    %177 = vector.shape_cast %176 : vector<8xf32> to vector<8x1xf32>
    %178 = tpu.reciprocal %177 {approx = true} : vector<8x1xf32> -> vector<8x1xf32>
    %179 = vector.broadcast %178 : vector<8x1xf32> to vector<8x8xf32>
    %180 = arith.mulf %175, %179 : vector<8x8xf32>
    %cst_61 = arith.constant dense<0.000000e+00> : vector<8x8xf32>
    %181 = tpu.matmul %180, %164, %cst_61 {dimension_numbers = #tpu.dot_dimension_numbers<[1], [0], [0], [1], [0, 0, 1, 1], [], []>} : vector<8x8xf32>, vector<8x8xf32>, vector<8x8xf32> -> vector<8x8xf32>
    %182 = vector.extract_strided_slice %40 {offsets = [8, 24], sizes = [8, 8], strides = [1, 1]} : vector<16x96xf32> to vector<8x8xf32>
    %183 = vector.extract_strided_slice %40 {offsets = [8, 56], sizes = [8, 8], strides = [1, 1]} : vector<16x96xf32> to vector<8x8xf32>
    %184 = vector.extract_strided_slice %40 {offsets = [8, 88], sizes = [8, 8], strides = [1, 1]} : vector<16x96xf32> to vector<8x8xf32>
    %185 = tpu.transpose %183, [1, 0] : vector<8x8xf32> -> vector<8x8xf32>
    %cst_62 = arith.constant dense<0.000000e+00> : vector<8x8xf32>
    %186 = tpu.matmul %182, %185, %cst_62 {dimension_numbers = #tpu.dot_dimension_numbers<[1], [0], [0], [1], [0, 0, 1, 1], [], []>} : vector<8x8xf32>, vector<8x8xf32>, vector<8x8xf32> -> vector<8x8xf32>
    %cst_63 = arith.constant 0.353553385 : f32
    %187 = vector.broadcast %cst_63 : f32 to vector<8x8xf32>
    %188 = arith.mulf %186, %187 : vector<8x8xf32>
    %cst_64 = arith.constant 0xFF800000 : f32
    %189 = vector.broadcast %cst_64 : f32 to vector<8x8xf32>
    %190 = arith.select %2, %188, %189 : vector<8x8xi1>, vector<8x8xf32>
    %cst_65 = arith.constant dense<0xFF800000> : vector<8xf32>
    %191 = vector.multi_reduction <maximumf>, %190, %cst_65 [1] : vector<8x8xf32> to vector<8xf32>
    %192 = vector.shape_cast %191 : vector<8xf32> to vector<8x1xf32>
    %193 = vector.broadcast %192 : vector<8x1xf32> to vector<8x8xf32>
    %194 = arith.subf %190, %193 : vector<8x8xf32>
    %195 = math.exp %194 : vector<8x8xf32>
    %cst_66 = arith.constant dense<0.000000e+00> : vector<8xf32>
    %196 = vector.multi_reduction <add>, %195, %cst_66 [1] : vector<8x8xf32> to vector<8xf32>
    %197 = vector.shape_cast %196 : vector<8xf32> to vector<8x1xf32>
    %198 = tpu.reciprocal %197 {approx = true} : vector<8x1xf32> -> vector<8x1xf32>
    %199 = vector.broadcast %198 : vector<8x1xf32> to vector<8x8xf32>
    %200 = arith.mulf %195, %199 : vector<8x8xf32>
    %cst_67 = arith.constant dense<0.000000e+00> : vector<8x8xf32>
    %201 = tpu.matmul %200, %184, %cst_67 {dimension_numbers = #tpu.dot_dimension_numbers<[1], [0], [0], [1], [0, 0, 1, 1], [], []>} : vector<8x8xf32>, vector<8x8xf32>, vector<8x8xf32> -> vector<8x8xf32>
    %202 = tpu.concatenate %141, %161, %181, %201 in 1 : vector<8x8xf32>, vector<8x8xf32>, vector<8x8xf32>, vector<8x8xf32> -> vector<8x32xf32>
    %203 = tpu.concatenate %121, %202 in 0 : vector<8x32xf32>, vector<8x32xf32> -> vector<16x32xf32>
    %c0_68 = arith.constant 0 : index
    %c0_69 = arith.constant 0 : index
    %c0_70 = arith.constant 0 : index
    %204 = vector.load %arg7[%c0_68, %c0_69, %c0_70] : memref<2x32x32xbf16, #tpu.memory_space<vmem>>, vector<1x32x32xbf16>
    %205 = vector.shape_cast %204 : vector<1x32x32xbf16> to vector<32x32xbf16>
    %206 = arith.truncf %203 : vector<16x32xf32> to vector<16x32xbf16>
    %cst_71 = arith.constant dense<0.000000e+00> : vector<16x32xf32>
    %207 = tpu.matmul %206, %205, %cst_71 {dimension_numbers = #tpu.dot_dimension_numbers<[1], [0], [0], [1], [0, 0, 1, 1], [], []>} : vector<16x32xbf16>, vector<32x32xbf16>, vector<16x32xf32> -> vector<16x32xf32>
    %208 = arith.addf %6, %207 : vector<16x32xf32>
    %c0_72 = arith.constant 0 : index
    %c0_73 = arith.constant 0 : index
    %c0_74 = arith.constant 0 : index
    %209 = vector.load %arg8[%c0_72, %c0_73, %c0_74] : memref<2x1x32xf32, #tpu.memory_space<vmem>>, vector<1x1x32xf32>
    %210 = vector.shape_cast %209 : vector<1x1x32xf32> to vector<1x32xf32>
    %211 = vector.broadcast %210 : vector<1x32xf32> to vector<16x32xf32>
    %212 = arith.addf %208, %211 : vector<16x32xf32>
    %c0_75 = arith.constant 0 : index
    %c0_76 = arith.constant 0 : index
    %c0_77 = arith.constant 0 : index
    %213 = vector.load %arg9[%c0_75, %c0_76, %c0_77] : memref<2x1x32xf32, #tpu.memory_space<vmem>>, vector<1x1x32xf32>
    %214 = vector.shape_cast %213 : vector<1x1x32xf32> to vector<1x32xf32>
    %c0_78 = arith.constant 0 : index
    %c0_79 = arith.constant 0 : index
    %c0_80 = arith.constant 0 : index
    %215 = vector.load %arg10[%c0_78, %c0_79, %c0_80] : memref<2x1x32xf32, #tpu.memory_space<vmem>>, vector<1x1x32xf32>
    %216 = vector.shape_cast %215 : vector<1x1x32xf32> to vector<1x32xf32>
    %cst_81 = arith.constant dense<0.000000e+00> : vector<16xf32>
    %217 = vector.multi_reduction <add>, %212, %cst_81 [1] : vector<16x32xf32> to vector<16xf32>
    %218 = vector.shape_cast %217 : vector<16xf32> to vector<16x1xf32>
    %cst_82 = arith.constant 3.200000e+01 : f32
    %219 = vector.broadcast %cst_82 : f32 to vector<16x1xf32>
    %220 = arith.divf %218, %219 : vector<16x1xf32>
    %221 = vector.broadcast %220 : vector<16x1xf32> to vector<16x32xf32>
    %222 = arith.subf %212, %221 : vector<16x32xf32>
    %223 = arith.mulf %222, %222 : vector<16x32xf32>
    %cst_83 = arith.constant dense<0.000000e+00> : vector<16xf32>
    %224 = vector.multi_reduction <add>, %223, %cst_83 [1] : vector<16x32xf32> to vector<16xf32>
    %225 = vector.shape_cast %224 : vector<16xf32> to vector<16x1xf32>
    %cst_84 = arith.constant 3.200000e+01 : f32
    %226 = vector.broadcast %cst_84 : f32 to vector<16x1xf32>
    %227 = arith.divf %225, %226 : vector<16x1xf32>
    %228 = vector.broadcast %220 : vector<16x1xf32> to vector<16x32xf32>
    %229 = arith.subf %212, %228 : vector<16x32xf32>
    %cst_85 = arith.constant 9.99999974E-6 : f32
    %230 = vector.broadcast %cst_85 : f32 to vector<16x1xf32>
    %231 = arith.addf %227, %230 : vector<16x1xf32>
    %232 = math.rsqrt %231 : vector<16x1xf32>
    %233 = vector.broadcast %232 : vector<16x1xf32> to vector<16x32xf32>
    %234 = arith.mulf %229, %233 : vector<16x32xf32>
    %235 = vector.broadcast %214 : vector<1x32xf32> to vector<16x32xf32>
    %236 = arith.mulf %234, %235 : vector<16x32xf32>
    %237 = vector.broadcast %216 : vector<1x32xf32> to vector<16x32xf32>
    %238 = arith.addf %236, %237 : vector<16x32xf32>
    %c0_86 = arith.constant 0 : index
    %c0_87 = arith.constant 0 : index
    %c0_88 = arith.constant 0 : index
    %239 = vector.load %arg11[%c0_86, %c0_87, %c0_88] : memref<2x32x128xbf16, #tpu.memory_space<vmem>>, vector<1x32x128xbf16>
    %240 = vector.shape_cast %239 : vector<1x32x128xbf16> to vector<32x128xbf16>
    %241 = arith.truncf %238 : vector<16x32xf32> to vector<16x32xbf16>
    %cst_89 = arith.constant dense<0.000000e+00> : vector<16x128xf32>
    %242 = tpu.matmul %241, %240, %cst_89 {dimension_numbers = #tpu.dot_dimension_numbers<[1], [0], [0], [1], [0, 0, 1, 1], [], []>} : vector<16x32xbf16>, vector<32x128xbf16>, vector<16x128xf32> -> vector<16x128xf32>
    %c0_90 = arith.constant 0 : index
    %c0_91 = arith.constant 0 : index
    %c0_92 = arith.constant 0 : index
    %243 = vector.load %arg12[%c0_90, %c0_91, %c0_92] : memref<2x1x128xf32, #tpu.memory_space<vmem>>, vector<1x1x128xf32>
    %244 = vector.shape_cast %243 : vector<1x1x128xf32> to vector<1x128xf32>
    %245 = vector.broadcast %244 : vector<1x128xf32> to vector<16x128xf32>
    %246 = arith.addf %242, %245 : vector<16x128xf32>
    %cst_93 = arith.constant 1.702000e+00 : f32
    %247 = vector.broadcast %cst_93 : f32 to vector<16x128xf32>
    %248 = arith.mulf %247, %246 : vector<16x128xf32>
    %249 = arith.negf %248 : vector<16x128xf32>
    %250 = math.exp %249 : vector<16x128xf32>
    %cst_94 = arith.constant 1.000000e+00 : f32
    %251 = vector.broadcast %cst_94 : f32 to vector<16x128xf32>
    %252 = arith.addf %251, %250 : vector<16x128xf32>
    %253 = arith.divf %251, %252 : vector<16x128xf32>
    %254 = arith.mulf %246, %253 : vector<16x128xf32>
    %c0_95 = arith.constant 0 : index
    %c0_96 = arith.constant 0 : index
    %c0_97 = arith.constant 0 : index
    %255 = vector.load %arg13[%c0_95, %c0_96, %c0_97] : memref<2x128x32xbf16, #tpu.memory_space<vmem>>, vector<1x128x32xbf16>
    %256 = vector.shape_cast %255 : vector<1x128x32xbf16> to vector<128x32xbf16>
    %257 = arith.truncf %254 : vector<16x128xf32> to vector<16x128xbf16>
    %cst_98 = arith.constant dense<0.000000e+00> : vector<16x32xf32>
    %258 = tpu.matmul %257, %256, %cst_98 {dimension_numbers = #tpu.dot_dimension_numbers<[1], [0], [0], [1], [0, 0, 1, 1], [], []>} : vector<16x128xbf16>, vector<128x32xbf16>, vector<16x32xf32> -> vector<16x32xf32>
    %259 = arith.addf %212, %258 : vector<16x32xf32>
    %c0_99 = arith.constant 0 : index
    %c0_100 = arith.constant 0 : index
    %c0_101 = arith.constant 0 : index
    %260 = vector.load %arg14[%c0_99, %c0_100, %c0_101] : memref<2x1x32xf32, #tpu.memory_space<vmem>>, vector<1x1x32xf32>
    %261 = vector.shape_cast %260 : vector<1x1x32xf32> to vector<1x32xf32>
    %262 = vector.broadcast %261 : vector<1x32xf32> to vector<16x32xf32>
    %263 = arith.addf %259, %262 : vector<16x32xf32>
    %c1 = arith.constant 1 : index
    %c0_102 = arith.constant 0 : index
    %c0_103 = arith.constant 0 : index
    %264 = vector.load %arg3[%c1, %c0_102, %c0_103] : memref<2x1x32xf32, #tpu.memory_space<vmem>>, vector<1x1x32xf32>
    %265 = vector.shape_cast %264 : vector<1x1x32xf32> to vector<1x32xf32>
    %c1_104 = arith.constant 1 : index
    %c0_105 = arith.constant 0 : index
    %c0_106 = arith.constant 0 : index
    %266 = vector.load %arg4[%c1_104, %c0_105, %c0_106] : memref<2x1x32xf32, #tpu.memory_space<vmem>>, vector<1x1x32xf32>
    %267 = vector.shape_cast %266 : vector<1x1x32xf32> to vector<1x32xf32>
    %cst_107 = arith.constant dense<0.000000e+00> : vector<16xf32>
    %268 = vector.multi_reduction <add>, %263, %cst_107 [1] : vector<16x32xf32> to vector<16xf32>
    %269 = vector.shape_cast %268 : vector<16xf32> to vector<16x1xf32>
    %cst_108 = arith.constant 3.200000e+01 : f32
    %270 = vector.broadcast %cst_108 : f32 to vector<16x1xf32>
    %271 = arith.divf %269, %270 : vector<16x1xf32>
    %272 = vector.broadcast %271 : vector<16x1xf32> to vector<16x32xf32>
    %273 = arith.subf %263, %272 : vector<16x32xf32>
    %274 = arith.mulf %273, %273 : vector<16x32xf32>
    %cst_109 = arith.constant dense<0.000000e+00> : vector<16xf32>
    %275 = vector.multi_reduction <add>, %274, %cst_109 [1] : vector<16x32xf32> to vector<16xf32>
    %276 = vector.shape_cast %275 : vector<16xf32> to vector<16x1xf32>
    %cst_110 = arith.constant 3.200000e+01 : f32
    %277 = vector.broadcast %cst_110 : f32 to vector<16x1xf32>
    %278 = arith.divf %276, %277 : vector<16x1xf32>
    %279 = vector.broadcast %271 : vector<16x1xf32> to vector<16x32xf32>
    %280 = arith.subf %263, %279 : vector<16x32xf32>
    %cst_111 = arith.constant 9.99999974E-6 : f32
    %281 = vector.broadcast %cst_111 : f32 to vector<16x1xf32>
    %282 = arith.addf %278, %281 : vector<16x1xf32>
    %283 = math.rsqrt %282 : vector<16x1xf32>
    %284 = vector.broadcast %283 : vector<16x1xf32> to vector<16x32xf32>
    %285 = arith.mulf %280, %284 : vector<16x32xf32>
    %286 = vector.broadcast %265 : vector<1x32xf32> to vector<16x32xf32>
    %287 = arith.mulf %285, %286 : vector<16x32xf32>
    %288 = vector.broadcast %267 : vector<1x32xf32> to vector<16x32xf32>
    %289 = arith.addf %287, %288 : vector<16x32xf32>
    %c1_112 = arith.constant 1 : index
    %c0_113 = arith.constant 0 : index
    %c0_114 = arith.constant 0 : index
    %290 = vector.load %arg5[%c1_112, %c0_113, %c0_114] : memref<2x32x96xbf16, #tpu.memory_space<vmem>>, vector<1x32x96xbf16>
    %291 = vector.shape_cast %290 : vector<1x32x96xbf16> to vector<32x96xbf16>
    %292 = arith.truncf %289 : vector<16x32xf32> to vector<16x32xbf16>
    %cst_115 = arith.constant dense<0.000000e+00> : vector<16x96xf32>
    %293 = tpu.matmul %292, %291, %cst_115 {dimension_numbers = #tpu.dot_dimension_numbers<[1], [0], [0], [1], [0, 0, 1, 1], [], []>} : vector<16x32xbf16>, vector<32x96xbf16>, vector<16x96xf32> -> vector<16x96xf32>
    %c1_116 = arith.constant 1 : index
    %c0_117 = arith.constant 0 : index
    %c0_118 = arith.constant 0 : index
    %294 = vector.load %arg6[%c1_116, %c0_117, %c0_118] : memref<2x1x96xf32, #tpu.memory_space<vmem>>, vector<1x1x96xf32>
    %295 = vector.shape_cast %294 : vector<1x1x96xf32> to vector<1x96xf32>
    %296 = vector.broadcast %295 : vector<1x96xf32> to vector<16x96xf32>
    %297 = arith.addf %293, %296 : vector<16x96xf32>
    %298 = vector.extract_strided_slice %297 {offsets = [0, 0], sizes = [8, 8], strides = [1, 1]} : vector<16x96xf32> to vector<8x8xf32>
    %299 = vector.extract_strided_slice %297 {offsets = [0, 32], sizes = [8, 8], strides = [1, 1]} : vector<16x96xf32> to vector<8x8xf32>
    %300 = vector.extract_strided_slice %297 {offsets = [0, 64], sizes = [8, 8], strides = [1, 1]} : vector<16x96xf32> to vector<8x8xf32>
    %301 = tpu.transpose %299, [1, 0] : vector<8x8xf32> -> vector<8x8xf32>
    %cst_119 = arith.constant dense<0.000000e+00> : vector<8x8xf32>
    %302 = tpu.matmul %298, %301, %cst_119 {dimension_numbers = #tpu.dot_dimension_numbers<[1], [0], [0], [1], [0, 0, 1, 1], [], []>} : vector<8x8xf32>, vector<8x8xf32>, vector<8x8xf32> -> vector<8x8xf32>
    %cst_120 = arith.constant 0.353553385 : f32
    %303 = vector.broadcast %cst_120 : f32 to vector<8x8xf32>
    %304 = arith.mulf %302, %303 : vector<8x8xf32>
    %cst_121 = arith.constant 0xFF800000 : f32
    %305 = vector.broadcast %cst_121 : f32 to vector<8x8xf32>
    %306 = arith.select %2, %304, %305 : vector<8x8xi1>, vector<8x8xf32>
    %cst_122 = arith.constant dense<0xFF800000> : vector<8xf32>
    %307 = vector.multi_reduction <maximumf>, %306, %cst_122 [1] : vector<8x8xf32> to vector<8xf32>
    %308 = vector.shape_cast %307 : vector<8xf32> to vector<8x1xf32>
    %309 = vector.broadcast %308 : vector<8x1xf32> to vector<8x8xf32>
    %310 = arith.subf %306, %309 : vector<8x8xf32>
    %311 = math.exp %310 : vector<8x8xf32>
    %cst_123 = arith.constant dense<0.000000e+00> : vector<8xf32>
    %312 = vector.multi_reduction <add>, %311, %cst_123 [1] : vector<8x8xf32> to vector<8xf32>
    %313 = vector.shape_cast %312 : vector<8xf32> to vector<8x1xf32>
    %314 = tpu.reciprocal %313 {approx = true} : vector<8x1xf32> -> vector<8x1xf32>
    %315 = vector.broadcast %314 : vector<8x1xf32> to vector<8x8xf32>
    %316 = arith.mulf %311, %315 : vector<8x8xf32>
    %cst_124 = arith.constant dense<0.000000e+00> : vector<8x8xf32>
    %317 = tpu.matmul %316, %300, %cst_124 {dimension_numbers = #tpu.dot_dimension_numbers<[1], [0], [0], [1], [0, 0, 1, 1], [], []>} : vector<8x8xf32>, vector<8x8xf32>, vector<8x8xf32> -> vector<8x8xf32>
    %318 = vector.extract_strided_slice %297 {offsets = [0, 8], sizes = [8, 8], strides = [1, 1]} : vector<16x96xf32> to vector<8x8xf32>
    %319 = vector.extract_strided_slice %297 {offsets = [0, 40], sizes = [8, 8], strides = [1, 1]} : vector<16x96xf32> to vector<8x8xf32>
    %320 = vector.extract_strided_slice %297 {offsets = [0, 72], sizes = [8, 8], strides = [1, 1]} : vector<16x96xf32> to vector<8x8xf32>
    %321 = tpu.transpose %319, [1, 0] : vector<8x8xf32> -> vector<8x8xf32>
    %cst_125 = arith.constant dense<0.000000e+00> : vector<8x8xf32>
    %322 = tpu.matmul %318, %321, %cst_125 {dimension_numbers = #tpu.dot_dimension_numbers<[1], [0], [0], [1], [0, 0, 1, 1], [], []>} : vector<8x8xf32>, vector<8x8xf32>, vector<8x8xf32> -> vector<8x8xf32>
    %cst_126 = arith.constant 0.353553385 : f32
    %323 = vector.broadcast %cst_126 : f32 to vector<8x8xf32>
    %324 = arith.mulf %322, %323 : vector<8x8xf32>
    %cst_127 = arith.constant 0xFF800000 : f32
    %325 = vector.broadcast %cst_127 : f32 to vector<8x8xf32>
    %326 = arith.select %2, %324, %325 : vector<8x8xi1>, vector<8x8xf32>
    %cst_128 = arith.constant dense<0xFF800000> : vector<8xf32>
    %327 = vector.multi_reduction <maximumf>, %326, %cst_128 [1] : vector<8x8xf32> to vector<8xf32>
    %328 = vector.shape_cast %327 : vector<8xf32> to vector<8x1xf32>
    %329 = vector.broadcast %328 : vector<8x1xf32> to vector<8x8xf32>
    %330 = arith.subf %326, %329 : vector<8x8xf32>
    %331 = math.exp %330 : vector<8x8xf32>
    %cst_129 = arith.constant dense<0.000000e+00> : vector<8xf32>
    %332 = vector.multi_reduction <add>, %331, %cst_129 [1] : vector<8x8xf32> to vector<8xf32>
    %333 = vector.shape_cast %332 : vector<8xf32> to vector<8x1xf32>
    %334 = tpu.reciprocal %333 {approx = true} : vector<8x1xf32> -> vector<8x1xf32>
    %335 = vector.broadcast %334 : vector<8x1xf32> to vector<8x8xf32>
    %336 = arith.mulf %331, %335 : vector<8x8xf32>
    %cst_130 = arith.constant dense<0.000000e+00> : vector<8x8xf32>
    %337 = tpu.matmul %336, %320, %cst_130 {dimension_numbers = #tpu.dot_dimension_numbers<[1], [0], [0], [1], [0, 0, 1, 1], [], []>} : vector<8x8xf32>, vector<8x8xf32>, vector<8x8xf32> -> vector<8x8xf32>
    %338 = vector.extract_strided_slice %297 {offsets = [0, 16], sizes = [8, 8], strides = [1, 1]} : vector<16x96xf32> to vector<8x8xf32>
    %339 = vector.extract_strided_slice %297 {offsets = [0, 48], sizes = [8, 8], strides = [1, 1]} : vector<16x96xf32> to vector<8x8xf32>
    %340 = vector.extract_strided_slice %297 {offsets = [0, 80], sizes = [8, 8], strides = [1, 1]} : vector<16x96xf32> to vector<8x8xf32>
    %341 = tpu.transpose %339, [1, 0] : vector<8x8xf32> -> vector<8x8xf32>
    %cst_131 = arith.constant dense<0.000000e+00> : vector<8x8xf32>
    %342 = tpu.matmul %338, %341, %cst_131 {dimension_numbers = #tpu.dot_dimension_numbers<[1], [0], [0], [1], [0, 0, 1, 1], [], []>} : vector<8x8xf32>, vector<8x8xf32>, vector<8x8xf32> -> vector<8x8xf32>
    %cst_132 = arith.constant 0.353553385 : f32
    %343 = vector.broadcast %cst_132 : f32 to vector<8x8xf32>
    %344 = arith.mulf %342, %343 : vector<8x8xf32>
    %cst_133 = arith.constant 0xFF800000 : f32
    %345 = vector.broadcast %cst_133 : f32 to vector<8x8xf32>
    %346 = arith.select %2, %344, %345 : vector<8x8xi1>, vector<8x8xf32>
    %cst_134 = arith.constant dense<0xFF800000> : vector<8xf32>
    %347 = vector.multi_reduction <maximumf>, %346, %cst_134 [1] : vector<8x8xf32> to vector<8xf32>
    %348 = vector.shape_cast %347 : vector<8xf32> to vector<8x1xf32>
    %349 = vector.broadcast %348 : vector<8x1xf32> to vector<8x8xf32>
    %350 = arith.subf %346, %349 : vector<8x8xf32>
    %351 = math.exp %350 : vector<8x8xf32>
    %cst_135 = arith.constant dense<0.000000e+00> : vector<8xf32>
    %352 = vector.multi_reduction <add>, %351, %cst_135 [1] : vector<8x8xf32> to vector<8xf32>
    %353 = vector.shape_cast %352 : vector<8xf32> to vector<8x1xf32>
    %354 = tpu.reciprocal %353 {approx = true} : vector<8x1xf32> -> vector<8x1xf32>
    %355 = vector.broadcast %354 : vector<8x1xf32> to vector<8x8xf32>
    %356 = arith.mulf %351, %355 : vector<8x8xf32>
    %cst_136 = arith.constant dense<0.000000e+00> : vector<8x8xf32>
    %357 = tpu.matmul %356, %340, %cst_136 {dimension_numbers = #tpu.dot_dimension_numbers<[1], [0], [0], [1], [0, 0, 1, 1], [], []>} : vector<8x8xf32>, vector<8x8xf32>, vector<8x8xf32> -> vector<8x8xf32>
    %358 = vector.extract_strided_slice %297 {offsets = [0, 24], sizes = [8, 8], strides = [1, 1]} : vector<16x96xf32> to vector<8x8xf32>
    %359 = vector.extract_strided_slice %297 {offsets = [0, 56], sizes = [8, 8], strides = [1, 1]} : vector<16x96xf32> to vector<8x8xf32>
    %360 = vector.extract_strided_slice %297 {offsets = [0, 88], sizes = [8, 8], strides = [1, 1]} : vector<16x96xf32> to vector<8x8xf32>
    %361 = tpu.transpose %359, [1, 0] : vector<8x8xf32> -> vector<8x8xf32>
    %cst_137 = arith.constant dense<0.000000e+00> : vector<8x8xf32>
    %362 = tpu.matmul %358, %361, %cst_137 {dimension_numbers = #tpu.dot_dimension_numbers<[1], [0], [0], [1], [0, 0, 1, 1], [], []>} : vector<8x8xf32>, vector<8x8xf32>, vector<8x8xf32> -> vector<8x8xf32>
    %cst_138 = arith.constant 0.353553385 : f32
    %363 = vector.broadcast %cst_138 : f32 to vector<8x8xf32>
    %364 = arith.mulf %362, %363 : vector<8x8xf32>
    %cst_139 = arith.constant 0xFF800000 : f32
    %365 = vector.broadcast %cst_139 : f32 to vector<8x8xf32>
    %366 = arith.select %2, %364, %365 : vector<8x8xi1>, vector<8x8xf32>
    %cst_140 = arith.constant dense<0xFF800000> : vector<8xf32>
    %367 = vector.multi_reduction <maximumf>, %366, %cst_140 [1] : vector<8x8xf32> to vector<8xf32>
    %368 = vector.shape_cast %367 : vector<8xf32> to vector<8x1xf32>
    %369 = vector.broadcast %368 : vector<8x1xf32> to vector<8x8xf32>
    %370 = arith.subf %366, %369 : vector<8x8xf32>
    %371 = math.exp %370 : vector<8x8xf32>
    %cst_141 = arith.constant dense<0.000000e+00> : vector<8xf32>
    %372 = vector.multi_reduction <add>, %371, %cst_141 [1] : vector<8x8xf32> to vector<8xf32>
    %373 = vector.shape_cast %372 : vector<8xf32> to vector<8x1xf32>
    %374 = tpu.reciprocal %373 {approx = true} : vector<8x1xf32> -> vector<8x1xf32>
    %375 = vector.broadcast %374 : vector<8x1xf32> to vector<8x8xf32>
    %376 = arith.mulf %371, %375 : vector<8x8xf32>
    %cst_142 = arith.constant dense<0.000000e+00> : vector<8x8xf32>
    %377 = tpu.matmul %376, %360, %cst_142 {dimension_numbers = #tpu.dot_dimension_numbers<[1], [0], [0], [1], [0, 0, 1, 1], [], []>} : vector<8x8xf32>, vector<8x8xf32>, vector<8x8xf32> -> vector<8x8xf32>
    %378 = tpu.concatenate %317, %337, %357, %377 in 1 : vector<8x8xf32>, vector<8x8xf32>, vector<8x8xf32>, vector<8x8xf32> -> vector<8x32xf32>
    %379 = vector.extract_strided_slice %297 {offsets = [8, 0], sizes = [8, 8], strides = [1, 1]} : vector<16x96xf32> to vector<8x8xf32>
    %380 = vector.extract_strided_slice %297 {offsets = [8, 32], sizes = [8, 8], strides = [1, 1]} : vector<16x96xf32> to vector<8x8xf32>
    %381 = vector.extract_strided_slice %297 {offsets = [8, 64], sizes = [8, 8], strides = [1, 1]} : vector<16x96xf32> to vector<8x8xf32>
    %382 = tpu.transpose %380, [1, 0] : vector<8x8xf32> -> vector<8x8xf32>
    %cst_143 = arith.constant dense<0.000000e+00> : vector<8x8xf32>
    %383 = tpu.matmul %379, %382, %cst_143 {dimension_numbers = #tpu.dot_dimension_numbers<[1], [0], [0], [1], [0, 0, 1, 1], [], []>} : vector<8x8xf32>, vector<8x8xf32>, vector<8x8xf32> -> vector<8x8xf32>
    %cst_144 = arith.constant 0.353553385 : f32
    %384 = vector.broadcast %cst_144 : f32 to vector<8x8xf32>
    %385 = arith.mulf %383, %384 : vector<8x8xf32>
    %cst_145 = arith.constant 0xFF800000 : f32
    %386 = vector.broadcast %cst_145 : f32 to vector<8x8xf32>
    %387 = arith.select %2, %385, %386 : vector<8x8xi1>, vector<8x8xf32>
    %cst_146 = arith.constant dense<0xFF800000> : vector<8xf32>
    %388 = vector.multi_reduction <maximumf>, %387, %cst_146 [1] : vector<8x8xf32> to vector<8xf32>
    %389 = vector.shape_cast %388 : vector<8xf32> to vector<8x1xf32>
    %390 = vector.broadcast %389 : vector<8x1xf32> to vector<8x8xf32>
    %391 = arith.subf %387, %390 : vector<8x8xf32>
    %392 = math.exp %391 : vector<8x8xf32>
    %cst_147 = arith.constant dense<0.000000e+00> : vector<8xf32>
    %393 = vector.multi_reduction <add>, %392, %cst_147 [1] : vector<8x8xf32> to vector<8xf32>
    %394 = vector.shape_cast %393 : vector<8xf32> to vector<8x1xf32>
    %395 = tpu.reciprocal %394 {approx = true} : vector<8x1xf32> -> vector<8x1xf32>
    %396 = vector.broadcast %395 : vector<8x1xf32> to vector<8x8xf32>
    %397 = arith.mulf %392, %396 : vector<8x8xf32>
    %cst_148 = arith.constant dense<0.000000e+00> : vector<8x8xf32>
    %398 = tpu.matmul %397, %381, %cst_148 {dimension_numbers = #tpu.dot_dimension_numbers<[1], [0], [0], [1], [0, 0, 1, 1], [], []>} : vector<8x8xf32>, vector<8x8xf32>, vector<8x8xf32> -> vector<8x8xf32>
    %399 = vector.extract_strided_slice %297 {offsets = [8, 8], sizes = [8, 8], strides = [1, 1]} : vector<16x96xf32> to vector<8x8xf32>
    %400 = vector.extract_strided_slice %297 {offsets = [8, 40], sizes = [8, 8], strides = [1, 1]} : vector<16x96xf32> to vector<8x8xf32>
    %401 = vector.extract_strided_slice %297 {offsets = [8, 72], sizes = [8, 8], strides = [1, 1]} : vector<16x96xf32> to vector<8x8xf32>
    %402 = tpu.transpose %400, [1, 0] : vector<8x8xf32> -> vector<8x8xf32>
    %cst_149 = arith.constant dense<0.000000e+00> : vector<8x8xf32>
    %403 = tpu.matmul %399, %402, %cst_149 {dimension_numbers = #tpu.dot_dimension_numbers<[1], [0], [0], [1], [0, 0, 1, 1], [], []>} : vector<8x8xf32>, vector<8x8xf32>, vector<8x8xf32> -> vector<8x8xf32>
    %cst_150 = arith.constant 0.353553385 : f32
    %404 = vector.broadcast %cst_150 : f32 to vector<8x8xf32>
    %405 = arith.mulf %403, %404 : vector<8x8xf32>
    %cst_151 = arith.constant 0xFF800000 : f32
    %406 = vector.broadcast %cst_151 : f32 to vector<8x8xf32>
    %407 = arith.select %2, %405, %406 : vector<8x8xi1>, vector<8x8xf32>
    %cst_152 = arith.constant dense<0xFF800000> : vector<8xf32>
    %408 = vector.multi_reduction <maximumf>, %407, %cst_152 [1] : vector<8x8xf32> to vector<8xf32>
    %409 = vector.shape_cast %408 : vector<8xf32> to vector<8x1xf32>
    %410 = vector.broadcast %409 : vector<8x1xf32> to vector<8x8xf32>
    %411 = arith.subf %407, %410 : vector<8x8xf32>
    %412 = math.exp %411 : vector<8x8xf32>
    %cst_153 = arith.constant dense<0.000000e+00> : vector<8xf32>
    %413 = vector.multi_reduction <add>, %412, %cst_153 [1] : vector<8x8xf32> to vector<8xf32>
    %414 = vector.shape_cast %413 : vector<8xf32> to vector<8x1xf32>
    %415 = tpu.reciprocal %414 {approx = true} : vector<8x1xf32> -> vector<8x1xf32>
    %416 = vector.broadcast %415 : vector<8x1xf32> to vector<8x8xf32>
    %417 = arith.mulf %412, %416 : vector<8x8xf32>
    %cst_154 = arith.constant dense<0.000000e+00> : vector<8x8xf32>
    %418 = tpu.matmul %417, %401, %cst_154 {dimension_numbers = #tpu.dot_dimension_numbers<[1], [0], [0], [1], [0, 0, 1, 1], [], []>} : vector<8x8xf32>, vector<8x8xf32>, vector<8x8xf32> -> vector<8x8xf32>
    %419 = vector.extract_strided_slice %297 {offsets = [8, 16], sizes = [8, 8], strides = [1, 1]} : vector<16x96xf32> to vector<8x8xf32>
    %420 = vector.extract_strided_slice %297 {offsets = [8, 48], sizes = [8, 8], strides = [1, 1]} : vector<16x96xf32> to vector<8x8xf32>
    %421 = vector.extract_strided_slice %297 {offsets = [8, 80], sizes = [8, 8], strides = [1, 1]} : vector<16x96xf32> to vector<8x8xf32>
    %422 = tpu.transpose %420, [1, 0] : vector<8x8xf32> -> vector<8x8xf32>
    %cst_155 = arith.constant dense<0.000000e+00> : vector<8x8xf32>
    %423 = tpu.matmul %419, %422, %cst_155 {dimension_numbers = #tpu.dot_dimension_numbers<[1], [0], [0], [1], [0, 0, 1, 1], [], []>} : vector<8x8xf32>, vector<8x8xf32>, vector<8x8xf32> -> vector<8x8xf32>
    %cst_156 = arith.constant 0.353553385 : f32
    %424 = vector.broadcast %cst_156 : f32 to vector<8x8xf32>
    %425 = arith.mulf %423, %424 : vector<8x8xf32>
    %cst_157 = arith.constant 0xFF800000 : f32
    %426 = vector.broadcast %cst_157 : f32 to vector<8x8xf32>
    %427 = arith.select %2, %425, %426 : vector<8x8xi1>, vector<8x8xf32>
    %cst_158 = arith.constant dense<0xFF800000> : vector<8xf32>
    %428 = vector.multi_reduction <maximumf>, %427, %cst_158 [1] : vector<8x8xf32> to vector<8xf32>
    %429 = vector.shape_cast %428 : vector<8xf32> to vector<8x1xf32>
    %430 = vector.broadcast %429 : vector<8x1xf32> to vector<8x8xf32>
    %431 = arith.subf %427, %430 : vector<8x8xf32>
    %432 = math.exp %431 : vector<8x8xf32>
    %cst_159 = arith.constant dense<0.000000e+00> : vector<8xf32>
    %433 = vector.multi_reduction <add>, %432, %cst_159 [1] : vector<8x8xf32> to vector<8xf32>
    %434 = vector.shape_cast %433 : vector<8xf32> to vector<8x1xf32>
    %435 = tpu.reciprocal %434 {approx = true} : vector<8x1xf32> -> vector<8x1xf32>
    %436 = vector.broadcast %435 : vector<8x1xf32> to vector<8x8xf32>
    %437 = arith.mulf %432, %436 : vector<8x8xf32>
    %cst_160 = arith.constant dense<0.000000e+00> : vector<8x8xf32>
    %438 = tpu.matmul %437, %421, %cst_160 {dimension_numbers = #tpu.dot_dimension_numbers<[1], [0], [0], [1], [0, 0, 1, 1], [], []>} : vector<8x8xf32>, vector<8x8xf32>, vector<8x8xf32> -> vector<8x8xf32>
    %439 = vector.extract_strided_slice %297 {offsets = [8, 24], sizes = [8, 8], strides = [1, 1]} : vector<16x96xf32> to vector<8x8xf32>
    %440 = vector.extract_strided_slice %297 {offsets = [8, 56], sizes = [8, 8], strides = [1, 1]} : vector<16x96xf32> to vector<8x8xf32>
    %441 = vector.extract_strided_slice %297 {offsets = [8, 88], sizes = [8, 8], strides = [1, 1]} : vector<16x96xf32> to vector<8x8xf32>
    %442 = tpu.transpose %440, [1, 0] : vector<8x8xf32> -> vector<8x8xf32>
    %cst_161 = arith.constant dense<0.000000e+00> : vector<8x8xf32>
    %443 = tpu.matmul %439, %442, %cst_161 {dimension_numbers = #tpu.dot_dimension_numbers<[1], [0], [0], [1], [0, 0, 1, 1], [], []>} : vector<8x8xf32>, vector<8x8xf32>, vector<8x8xf32> -> vector<8x8xf32>
    %cst_162 = arith.constant 0.353553385 : f32
    %444 = vector.broadcast %cst_162 : f32 to vector<8x8xf32>
    %445 = arith.mulf %443, %444 : vector<8x8xf32>
    %cst_163 = arith.constant 0xFF800000 : f32
    %446 = vector.broadcast %cst_163 : f32 to vector<8x8xf32>
    %447 = arith.select %2, %445, %446 : vector<8x8xi1>, vector<8x8xf32>
    %cst_164 = arith.constant dense<0xFF800000> : vector<8xf32>
    %448 = vector.multi_reduction <maximumf>, %447, %cst_164 [1] : vector<8x8xf32> to vector<8xf32>
    %449 = vector.shape_cast %448 : vector<8xf32> to vector<8x1xf32>
    %450 = vector.broadcast %449 : vector<8x1xf32> to vector<8x8xf32>
    %451 = arith.subf %447, %450 : vector<8x8xf32>
    %452 = math.exp %451 : vector<8x8xf32>
    %cst_165 = arith.constant dense<0.000000e+00> : vector<8xf32>
    %453 = vector.multi_reduction <add>, %452, %cst_165 [1] : vector<8x8xf32> to vector<8xf32>
    %454 = vector.shape_cast %453 : vector<8xf32> to vector<8x1xf32>
    %455 = tpu.reciprocal %454 {approx = true} : vector<8x1xf32> -> vector<8x1xf32>
    %456 = vector.broadcast %455 : vector<8x1xf32> to vector<8x8xf32>
    %457 = arith.mulf %452, %456 : vector<8x8xf32>
    %cst_166 = arith.constant dense<0.000000e+00> : vector<8x8xf32>
    %458 = tpu.matmul %457, %441, %cst_166 {dimension_numbers = #tpu.dot_dimension_numbers<[1], [0], [0], [1], [0, 0, 1, 1], [], []>} : vector<8x8xf32>, vector<8x8xf32>, vector<8x8xf32> -> vector<8x8xf32>
    %459 = tpu.concatenate %398, %418, %438, %458 in 1 : vector<8x8xf32>, vector<8x8xf32>, vector<8x8xf32>, vector<8x8xf32> -> vector<8x32xf32>
    %460 = tpu.concatenate %378, %459 in 0 : vector<8x32xf32>, vector<8x32xf32> -> vector<16x32xf32>
    %c1_167 = arith.constant 1 : index
    %c0_168 = arith.constant 0 : index
    %c0_169 = arith.constant 0 : index
    %461 = vector.load %arg7[%c1_167, %c0_168, %c0_169] : memref<2x32x32xbf16, #tpu.memory_space<vmem>>, vector<1x32x32xbf16>
    %462 = vector.shape_cast %461 : vector<1x32x32xbf16> to vector<32x32xbf16>
    %463 = arith.truncf %460 : vector<16x32xf32> to vector<16x32xbf16>
    %cst_170 = arith.constant dense<0.000000e+00> : vector<16x32xf32>
    %464 = tpu.matmul %463, %462, %cst_170 {dimension_numbers = #tpu.dot_dimension_numbers<[1], [0], [0], [1], [0, 0, 1, 1], [], []>} : vector<16x32xbf16>, vector<32x32xbf16>, vector<16x32xf32> -> vector<16x32xf32>
    %465 = arith.addf %263, %464 : vector<16x32xf32>
    %c1_171 = arith.constant 1 : index
    %c0_172 = arith.constant 0 : index
    %c0_173 = arith.constant 0 : index
    %466 = vector.load %arg8[%c1_171, %c0_172, %c0_173] : memref<2x1x32xf32, #tpu.memory_space<vmem>>, vector<1x1x32xf32>
    %467 = vector.shape_cast %466 : vector<1x1x32xf32> to vector<1x32xf32>
    %468 = vector.broadcast %467 : vector<1x32xf32> to vector<16x32xf32>
    %469 = arith.addf %465, %468 : vector<16x32xf32>
    %c1_174 = arith.constant 1 : index
    %c0_175 = arith.constant 0 : index
    %c0_176 = arith.constant 0 : index
    %470 = vector.load %arg9[%c1_174, %c0_175, %c0_176] : memref<2x1x32xf32, #tpu.memory_space<vmem>>, vector<1x1x32xf32>
    %471 = vector.shape_cast %470 : vector<1x1x32xf32> to vector<1x32xf32>
    %c1_177 = arith.constant 1 : index
    %c0_178 = arith.constant 0 : index
    %c0_179 = arith.constant 0 : index
    %472 = vector.load %arg10[%c1_177, %c0_178, %c0_179] : memref<2x1x32xf32, #tpu.memory_space<vmem>>, vector<1x1x32xf32>
    %473 = vector.shape_cast %472 : vector<1x1x32xf32> to vector<1x32xf32>
    %cst_180 = arith.constant dense<0.000000e+00> : vector<16xf32>
    %474 = vector.multi_reduction <add>, %469, %cst_180 [1] : vector<16x32xf32> to vector<16xf32>
    %475 = vector.shape_cast %474 : vector<16xf32> to vector<16x1xf32>
    %cst_181 = arith.constant 3.200000e+01 : f32
    %476 = vector.broadcast %cst_181 : f32 to vector<16x1xf32>
    %477 = arith.divf %475, %476 : vector<16x1xf32>
    %478 = vector.broadcast %477 : vector<16x1xf32> to vector<16x32xf32>
    %479 = arith.subf %469, %478 : vector<16x32xf32>
    %480 = arith.mulf %479, %479 : vector<16x32xf32>
    %cst_182 = arith.constant dense<0.000000e+00> : vector<16xf32>
    %481 = vector.multi_reduction <add>, %480, %cst_182 [1] : vector<16x32xf32> to vector<16xf32>
    %482 = vector.shape_cast %481 : vector<16xf32> to vector<16x1xf32>
    %cst_183 = arith.constant 3.200000e+01 : f32
    %483 = vector.broadcast %cst_183 : f32 to vector<16x1xf32>
    %484 = arith.divf %482, %483 : vector<16x1xf32>
    %485 = vector.broadcast %477 : vector<16x1xf32> to vector<16x32xf32>
    %486 = arith.subf %469, %485 : vector<16x32xf32>
    %cst_184 = arith.constant 9.99999974E-6 : f32
    %487 = vector.broadcast %cst_184 : f32 to vector<16x1xf32>
    %488 = arith.addf %484, %487 : vector<16x1xf32>
    %489 = math.rsqrt %488 : vector<16x1xf32>
    %490 = vector.broadcast %489 : vector<16x1xf32> to vector<16x32xf32>
    %491 = arith.mulf %486, %490 : vector<16x32xf32>
    %492 = vector.broadcast %471 : vector<1x32xf32> to vector<16x32xf32>
    %493 = arith.mulf %491, %492 : vector<16x32xf32>
    %494 = vector.broadcast %473 : vector<1x32xf32> to vector<16x32xf32>
    %495 = arith.addf %493, %494 : vector<16x32xf32>
    %c1_185 = arith.constant 1 : index
    %c0_186 = arith.constant 0 : index
    %c0_187 = arith.constant 0 : index
    %496 = vector.load %arg11[%c1_185, %c0_186, %c0_187] : memref<2x32x128xbf16, #tpu.memory_space<vmem>>, vector<1x32x128xbf16>
    %497 = vector.shape_cast %496 : vector<1x32x128xbf16> to vector<32x128xbf16>
    %498 = arith.truncf %495 : vector<16x32xf32> to vector<16x32xbf16>
    %cst_188 = arith.constant dense<0.000000e+00> : vector<16x128xf32>
    %499 = tpu.matmul %498, %497, %cst_188 {dimension_numbers = #tpu.dot_dimension_numbers<[1], [0], [0], [1], [0, 0, 1, 1], [], []>} : vector<16x32xbf16>, vector<32x128xbf16>, vector<16x128xf32> -> vector<16x128xf32>
    %c1_189 = arith.constant 1 : index
    %c0_190 = arith.constant 0 : index
    %c0_191 = arith.constant 0 : index
    %500 = vector.load %arg12[%c1_189, %c0_190, %c0_191] : memref<2x1x128xf32, #tpu.memory_space<vmem>>, vector<1x1x128xf32>
    %501 = vector.shape_cast %500 : vector<1x1x128xf32> to vector<1x128xf32>
    %502 = vector.broadcast %501 : vector<1x128xf32> to vector<16x128xf32>
    %503 = arith.addf %499, %502 : vector<16x128xf32>
    %cst_192 = arith.constant 1.702000e+00 : f32
    %504 = vector.broadcast %cst_192 : f32 to vector<16x128xf32>
    %505 = arith.mulf %504, %503 : vector<16x128xf32>
    %506 = arith.negf %505 : vector<16x128xf32>
    %507 = math.exp %506 : vector<16x128xf32>
    %cst_193 = arith.constant 1.000000e+00 : f32
    %508 = vector.broadcast %cst_193 : f32 to vector<16x128xf32>
    %509 = arith.addf %508, %507 : vector<16x128xf32>
    %510 = arith.divf %508, %509 : vector<16x128xf32>
    %511 = arith.mulf %503, %510 : vector<16x128xf32>
    %c1_194 = arith.constant 1 : index
    %c0_195 = arith.constant 0 : index
    %c0_196 = arith.constant 0 : index
    %512 = vector.load %arg13[%c1_194, %c0_195, %c0_196] : memref<2x128x32xbf16, #tpu.memory_space<vmem>>, vector<1x128x32xbf16>
    %513 = vector.shape_cast %512 : vector<1x128x32xbf16> to vector<128x32xbf16>
    %514 = arith.truncf %511 : vector<16x128xf32> to vector<16x128xbf16>
    %cst_197 = arith.constant dense<0.000000e+00> : vector<16x32xf32>
    %515 = tpu.matmul %514, %513, %cst_197 {dimension_numbers = #tpu.dot_dimension_numbers<[1], [0], [0], [1], [0, 0, 1, 1], [], []>} : vector<16x128xbf16>, vector<128x32xbf16>, vector<16x32xf32> -> vector<16x32xf32>
    %516 = arith.addf %469, %515 : vector<16x32xf32>
    %c1_198 = arith.constant 1 : index
    %c0_199 = arith.constant 0 : index
    %c0_200 = arith.constant 0 : index
    %517 = vector.load %arg14[%c1_198, %c0_199, %c0_200] : memref<2x1x32xf32, #tpu.memory_space<vmem>>, vector<1x1x32xf32>
    %518 = vector.shape_cast %517 : vector<1x1x32xf32> to vector<1x32xf32>
    %519 = vector.broadcast %518 : vector<1x32xf32> to vector<16x32xf32>
    %520 = arith.addf %516, %519 : vector<16x32xf32>
    %c0_201 = arith.constant 0 : index
    %c0_202 = arith.constant 0 : index
    %521 = vector.load %arg15[%c0_201, %c0_202] : memref<1x32xf32, #tpu.memory_space<vmem>>, vector<1x32xf32>
    %c0_203 = arith.constant 0 : index
    %c0_204 = arith.constant 0 : index
    %522 = vector.load %arg16[%c0_203, %c0_204] : memref<1x32xf32, #tpu.memory_space<vmem>>, vector<1x32xf32>
    %cst_205 = arith.constant dense<0.000000e+00> : vector<16xf32>
    %523 = vector.multi_reduction <add>, %520, %cst_205 [1] : vector<16x32xf32> to vector<16xf32>
    %524 = vector.shape_cast %523 : vector<16xf32> to vector<16x1xf32>
    %cst_206 = arith.constant 3.200000e+01 : f32
    %525 = vector.broadcast %cst_206 : f32 to vector<16x1xf32>
    %526 = arith.divf %524, %525 : vector<16x1xf32>
    %527 = vector.broadcast %526 : vector<16x1xf32> to vector<16x32xf32>
    %528 = arith.subf %520, %527 : vector<16x32xf32>
    %529 = arith.mulf %528, %528 : vector<16x32xf32>
    %cst_207 = arith.constant dense<0.000000e+00> : vector<16xf32>
    %530 = vector.multi_reduction <add>, %529, %cst_207 [1] : vector<16x32xf32> to vector<16xf32>
    %531 = vector.shape_cast %530 : vector<16xf32> to vector<16x1xf32>
    %cst_208 = arith.constant 3.200000e+01 : f32
    %532 = vector.broadcast %cst_208 : f32 to vector<16x1xf32>
    %533 = arith.divf %531, %532 : vector<16x1xf32>
    %534 = vector.broadcast %526 : vector<16x1xf32> to vector<16x32xf32>
    %535 = arith.subf %520, %534 : vector<16x32xf32>
    %cst_209 = arith.constant 9.99999974E-6 : f32
    %536 = vector.broadcast %cst_209 : f32 to vector<16x1xf32>
    %537 = arith.addf %533, %536 : vector<16x1xf32>
    %538 = math.rsqrt %537 : vector<16x1xf32>
    %539 = vector.broadcast %538 : vector<16x1xf32> to vector<16x32xf32>
    %540 = arith.mulf %535, %539 : vector<16x32xf32>
    %541 = vector.broadcast %521 : vector<1x32xf32> to vector<16x32xf32>
    %542 = arith.mulf %540, %541 : vector<16x32xf32>
    %543 = vector.broadcast %522 : vector<1x32xf32> to vector<16x32xf32>
    %544 = arith.addf %542, %543 : vector<16x32xf32>
    %c0_210 = arith.constant 0 : index
    %c0_211 = arith.constant 0 : index
    %545 = vector.load %arg2[%c0_210, %c0_211] : memref<2x16xf32, #tpu.memory_space<vmem>>, vector<2x16xf32>
    %cst_212 = arith.constant dense<0.000000e+00> : vector<2x32xf32>
    %546 = tpu.matmul %545, %544, %cst_212 {dimension_numbers = #tpu.dot_dimension_numbers<[1], [0], [0], [1], [0, 0, 1, 1], [], []>} : vector<2x16xf32>, vector<16x32xf32>, vector<2x32xf32> -> vector<2x32xf32>
    %c0_213 = arith.constant 0 : index
    %c0_214 = arith.constant 0 : index
    %547 = vector.load %arg17[%c0_213, %c0_214] : memref<32x16xbf16, #tpu.memory_space<vmem>>, vector<32x16xbf16>
    %548 = arith.truncf %546 : vector<2x32xf32> to vector<2x32xbf16>
    %cst_215 = arith.constant dense<0.000000e+00> : vector<2x16xf32>
    %549 = tpu.matmul %548, %547, %cst_215 {dimension_numbers = #tpu.dot_dimension_numbers<[1], [0], [0], [1], [0, 0, 1, 1], [], []>} : vector<2x32xbf16>, vector<32x16xbf16>, vector<2x16xf32> -> vector<2x16xf32>
    %c0_216 = arith.constant 0 : index
    %c0_217 = arith.constant 0 : index
    %550 = vector.load %arg18[%c0_216, %c0_217] : memref<2x16xf32, #tpu.memory_space<vmem>>, vector<2x16xf32>
    tpu.vector_store %arg18[%c0_216, %c0_217], %549 {strides = array<i32>} : memref<2x16xf32, #tpu.memory_space<vmem>>, vector<2x16xf32>,
    return
  }
}

</mosaic_0001>

<bundles_post_ra>
// kernel: text_encoder_forward.1
= control target key start
LH: loop header
LB: loop body
LE: loop exit
PB: predicated region body
PF: predicated region fallthrough
CT: control target
= control target key end

     0   :  { %s3124_s0 = inlined_call_operand.vmem [shape: f32[16,32], index: 0, kind: input, shape index: {}]   ;;  %s3125_s1 = inlined_call_operand.vmem [shape: f32[8,32], index: 1, kind: input, shape index: {}]   ;;  %s3126_s2 = inlined_call_operand.vmem [shape: f32[2,16], index: 2, kind: input, shape index: {}]   ;;  %s3127_s3 = inlined_call_operand.vmem [shape: f32[2,1,32], index: 3, kind: input, shape index: {}]   ;;  %s3128_s4 = inlined_call_operand.vmem [shape: f32[2,1,32], index: 4, kind: input, shape index: {}]   ;;  %s3129_s5 = inlined_call_operand.vmem [shape: bf16[2,32,96], index: 5, kind: input, shape index: {}]   ;;  %s3130_s6 = inlined_call_operand.vmem [shape: f32[2,1,96], index: 6, kind: input, shape index: {}]   ;;  %s3131_s7 = inlined_call_operand.vmem [shape: bf16[2,32,32], index: 7, kind: input, shape index: {}]   ;;  %s3132_s8 = inlined_call_operand.vmem [shape: f32[2,1,32], index: 8, kind: input, shape index: {}]   ;;  %s3133_s9 = inlined_call_operand.vmem [shape: f32[2,1,32], index: 9, kind: input, shape index: {}]   ;;  %s3134_s10 = inlined_call_operand.vmem [shape: f32[2,1,32], index: 10, kind: input, shape index: {}]   ;;  %s3135_s11 = inlined_call_operand.vmem [shape: bf16[2,32,128], index: 11, kind: input, shape index: {}]   ;;  %s3136_s12 = inlined_call_operand.vmem [shape: f32[2,1,128], index: 12, kind: input, shape index: {}]   ;;  %s3137_s13 = inlined_call_operand.vmem [shape: bf16[2,128,32], index: 13, kind: input, shape index: {}]   ;;  %s3138_s14 = inlined_call_operand.vmem [shape: f32[2,1,32], index: 14, kind: input, shape index: {}]   ;;  %s3139_s15 = inlined_call_operand.vmem [shape: f32[1,32], index: 15, kind: input, shape index: {}]   ;;  %s3140_s16 = inlined_call_operand.vmem [shape: f32[1,32], index: 16, kind: input, shape index: {}]   ;;  %s3141_s17 = inlined_call_operand.vmem [shape: bf16[32,16], index: 17, kind: input, shape index: {}]   ;;  %s3142_s18 = inlined_call_operand.hbm [shape: f32[2,16], index: 18, kind: output, shape index: {}]  }
   0x1   :  { %3160 = sst [smem:[#allocation5_spill]] %s3124_s0 }
   0x2   :  { %3161 = sst [smem:[#allocation6_spill]] %s3125_s1 }
   0x3   :  { %3162 = sst [smem:[#allocation7_spill]] %s3126_s2 }
   0x4   :  { %3163 = sst [smem:[#allocation8_spill]] %s3136_s12 }
   0x5   :  { %s3164_s29 = sld [smem:[#allocation6_spill]]  ;;  %vm73_vm0 = vcmask 261120  }
   0x6   :  { %s3165_s12 = sld [smem:[#allocation5_spill]] }
   0xb   :  { %v66_v0 = vld [vmem:[%s3164_s29] sm:$0xff] }
   0xc   :  { %v67_v1 = vld [vmem:[%s3165_s12] sm:$0xff]  ;;  %v68_v2 = vld [vmem:[%s3165_s12 + $0x8] sm:$0xff] }
   0xd   :  { %v2629_v3 = vadd.f32 %v67_v1, %v66_v0  ;;  %v2633_v5 = vadd.f32 %v68_v2, %v66_v0 }
   0xf   :  { %v74_v4 = vsel %vm73_vm0, %v2629_v3, 0.0 }
  0x10   :  { %75 = vadd.xlane.f32.xlu0 %v74_v4 }
  0x11   :  { %23 = vsyncpa [#allocation3], 0  ;;  %v77_v6 = vsel %vm73_vm0, %v2633_v5, 0.0  ;;  %v2509_v7 = vmov 32.0   ;;  %v2288_v24 = vld [vmem:[%s3129_s5 + $0x8] sm:$0xff]  ;;  %v2287_v26 = vld [vmem:[%s3129_s5] sm:$0xff]  ;;  %v61_v63 = vlaneseq }
  0x12   :  { %2381 = vrcp.f32 %v2509_v7  ;;  %165 = vmatpush.bf16.msra.mxu0 %v2288_v24  ;;  %v2363_v45 = vld [vmem:[%s3127_s3] ss:$0 sm:$0xff]  ;;  %s3152_s28 = smov 80   ;;  %s2511_s29 = smov 120   ;;  %vm176_vm8 = vcmask 64512   ;;  %vm454_vm10 = vcmask 130048  }
  0x13   :  { %v2364_v50 = vld [vmem:[%s3128_s4] ss:$0 sm:$0xff]  ;;  %s2512_s30 = smov 96   ;;  %s2513_s0 = smov 88   ;;  %v62_v0 = vshrl.u32 %v61_v63, 7  ;;  %v64_v1 = vand.u32 127, %v61_v63 }
  0x14   :  { %v2365_v55 = vld [vmem:[%s3130_s6] ss:$0 sm:$0xff]  ;;  %s3156_s19 = smov 112   ;;  %s2515_s1 = smov 72   ;;  %vm456_vm11 = vcmask 195584  }
  0x15   :  { %vm2682_vm9 = vcmp.le.s32.totalorder %v64_v1, %v62_v0  ;;  %s2516_s12 = smov 64   ;;  %s3158_s20 = smov 56  }
  0x16   :  { %166 = vmatpush.bf16.msra.mxu0 %v2287_v26  ;;  %s3145_s21 = smov 48   ;;  %s3147_s22 = smov 104  }
  0x17   :  { %s3154_s2 = smov 40   ;;  %s3149_s23 = smov 16  }
  0x18   :  { %78 = vadd.xlane.f32.xlu0 %v77_v6  ;;  %v2382_v8 = vpop.eup %2381  ;;  %s3151_s24 = smov 8   ;;  %s3150_s25 = smov 24  }
  0x19   :  { %v81_v9 = vmul.f32 32.0, %v2382_v8  ;;  %vm85_vm1 = vweird.f32 %v2382_v8 }
  0x1b   :  { %v82_v10 = vsub.f32 1.0, %v81_v9 }
  0x1d   :  { %v83_v11 = vmul.f32 %v2382_v8, %v82_v10 }
  0x1f   :  { %v84_v12 = vadd.f32 %v2382_v8, %v83_v11 }
  0x21   :  { %v2637_v13 = vsel %vm85_vm1, %v2382_v8, %v84_v12 }
  0x83   :  { %v76_v14 = vpop.xlane.xlu0 %75 }
  0x84   :  { %v87_v15 = vmul.f32 %v2637_v13, %v76_v14 }
  0x86   :  { %v89_v16 = vsub.f32 %v2629_v3, %v87_v15 }
  0x88   :  { %v91_v17 = vmul.f32 %v89_v16, %v89_v16 }
  0x8a   :  { %v93_v18 = vsel %vm73_vm0, %v91_v17, 0.0 }
  0x8b   :  { %94 = vadd.xlane.f32.xlu1 %v93_v18  ;;  %v79_v19 = vpop.xlane.xlu0 %78 }
  0x8c   :  { %v88_v20 = vmul.f32 %v2637_v13, %v79_v19 }
  0x8e   :  { %v90_v21 = vsub.f32 %v2633_v5, %v88_v20 }
  0x90   :  { %v92_v22 = vmul.f32 %v90_v21, %v90_v21 }
  0x92   :  { %v96_v23 = vsel %vm73_vm0, %v92_v22, 0.0 }
  0x93   :  { %97 = vadd.xlane.f32.xlu1 %v96_v23 }
  0xfe   :  { %v95_v25 = vpop.xlane.xlu1 %94 }
  0xff   :  { %v99_v27 = vmul.f32 %v95_v25, %v2637_v13 }
 0x101   :  { %v101_v28 = vadd.f32 1e-05, %v99_v27 }
 0x103   :  { %2383 = vrsqrt.f32 %v101_v28  ;;  %vm109_vm3 = vweird.f32 %v101_v28 }
 0x106   :  { %v98_v29 = vpop.xlane.xlu1 %97 }
 0x107   :  { %v100_v30 = vmul.f32 %v98_v29, %v2637_v13 }
 0x109   :  { %v2384_v31 = vpop.eup %2383  ;;  %v102_v32 = vadd.f32 1e-05, %v100_v30 }
 0x10a   :  { %v104_v33 = vmul.f32 %v2384_v31, %v101_v28  ;;  %vm110_vm2 = vweird.f32 %v2384_v31 }
 0x10b   :  { %2385 = vrsqrt.f32 %v102_v32  ;;  %vm111_vm4 = vmor %vm109_vm3, %vm110_vm2  ;;  %vm119_vm6 = vweird.f32 %v102_v32 }
 0x10c   :  { %v105_v34 = vmul.f32 %v2384_v31, %v104_v33 }
 0x10e   :  { %v106_v35 = vmul.f32 0.5, %v105_v34 }
 0x110   :  { %v107_v36 = vsub.f32 1.5, %v106_v35 }
 0x111   :  { %v2386_v37 = vpop.eup %2385 }
 0x112   :  { %v108_v38 = vmul.f32 %v2384_v31, %v107_v36  ;;  %v114_v39 = vmul.f32 %v2386_v37, %v102_v32  ;;  %vm120_vm5 = vweird.f32 %v2386_v37 }
 0x113   :  { %vm121_vm7 = vmor %vm119_vm6, %vm120_vm5 }
 0x114   :  { %v115_v40 = vmul.f32 %v2386_v37, %v114_v39  ;;  %v112_v41 = vsel %vm111_vm4, %v2384_v31, %v108_v38 }
 0x115   :  { %v123_v44 = vmul.f32 %v112_v41, %v89_v16 }
 0x116   :  { %v116_v42 = vmul.f32 0.5, %v115_v40 }
 0x117   :  { %v128_v49 = vmul.f32 %v2363_v45, %v123_v44 }
 0x118   :  { %v117_v43 = vsub.f32 1.5, %v116_v42 }
 0x119   :  { %v133_v52 = vadd.f32 %v2364_v50, %v128_v49 }
 0x11a   :  { %v118_v46 = vmul.f32 %v2386_v37, %v117_v43 }
 0x11c   :  { %v122_v47 = vsel %vm121_vm7, %v2386_v37, %v118_v46 }
 0x11d   :  { %v124_v48 = vmul.f32 %v122_v47, %v90_v21 }
 0x11f   :  { %v129_v51 = vmul.f32 %v2363_v45, %v124_v48 }
 0x121   :  { %v134_v53 = vadd.f32 %v2364_v50, %v129_v51 }
 0x123   :  { %v139_v54 = vpack.c.bf16 %v134_v53, %v133_v52 }
 0x125   :  { %2079 = vmatmul.msk.bf16.vlgmr.msra.gmra.mxu0 %vm73_vm0, %v139_v54 }
 0x1a2   :  { %v168_v56 = vpop.f32.mrf.mxu0 }
 0x1a3   :  { %v2663_v57 = vadd.f32 %v2365_v55, %v168_v56 }
 0x1a5   :  { %309 = vrot.lane.b32.xlu1 %v2663_v57, %s3152_s28  ;;  %240 = vrot.lane.b32.xlu0 %v2663_v57, %s2511_s29 }
 0x1a6   :  { %174 = vrot.lane.b32.xlu2 %v2663_v57, %s2512_s30 }
 0x1aa   :  { %v170_v18 = vpop.f32.mrf.mxu0 }
 0x1ab   :  { %v2697_v19 = vadd.f32 %v2365_v55, %v170_v18 }
 0x1ae   :  { %242 = vrot.lane.b32.xlu2 %v2663_v57, %s2513_s0 }
 0x1b6   :  { %307 = vrot.lane.b32.xlu2 %v2663_v57, %s3156_s19 }
 0x200   :  { %v175_v58 = vpop.permute.xlu2 %174 }
 0x201   :  { %2080 = vmatpush.xpose.msk.msra.mxu3 %vm176_vm8, %v175_v58 }
 0x204   :  { %2081 = vmatmul.msk.f32.vlgmr.msra.gmra.mxu3 %vm176_vm8, %v2663_v57 }
 0x208   :  { %v243_v59 = vpop.permute.xlu2 %242 }
 0x209   :  { %2083 = vmatpush.xpose.msk.msrb.mxu3 %vm176_vm8, %v243_v59 }
 0x210   :  { %v308_v62 = vpop.permute.xlu2 %307 }
 0x217   :  { %v310_v60 = vpop.permute.xlu1 %309  ;;  %v241_v61 = vpop.permute.xlu0 %240 }
 0x218   :  { %2084 = vmatmul.msk.f32.vlgmr.msrb.gmra.mxu3 %vm176_vm8, %v241_v61  ;;  %2086 = vmatpush.xpose.msk.msra.mxu1 %vm176_vm8, %v310_v60 }
 0x21b   :  { %2087 = vmatmul.msk.f32.vlgmr.msra.gmra.mxu1 %vm176_vm8, %v308_v62 }
 0x287   :  { %v198_v2 = vpop.f32.mrf.mxu3 }
 0x288   :  { %v201_v6 = vmul.f32 0.35355338, %v198_v2 }
 0x28a   :  { %v202_v7 = vsel %vm2682_vm9, %v201_v6, -inf }
 0x28b   :  { %v203_v8 = vsel %vm176_vm8, %v202_v7, -inf }
 0x28c   :  { %204 = vmax.xlane.f32.xlu2 %v203_v8 }
 0x298   :  { %v332_v9 = vpop.f32.mrf.mxu1 }
 0x299   :  { %v335_v10 = vmul.f32 0.35355338, %v332_v9 }
 0x29b   :  { %v265_v11 = vpop.f32.mrf.mxu3  ;;  %v336_v12 = vsel %vm2682_vm9, %v335_v10, -inf }
 0x29c   :  { %v268_v14 = vmul.f32 0.35355338, %v265_v11  ;;  %v337_v15 = vsel %vm176_vm8, %v336_v12, -inf }
 0x29d   :  { %338 = vmax.xlane.f32.xlu1 %v337_v15 }
 0x29e   :  { %v269_v16 = vsel %vm2682_vm9, %v268_v14, -inf }
 0x29f   :  { %v270_v17 = vsel %vm176_vm8, %v269_v16, -inf }
 0x2a0   :  { %271 = vmax.xlane.f32.xlu0 %v270_v17 }
 0x2a4   :  { %376 = vrot.lane.b32.xlu2 %v2663_v57, %s2515_s1 }
 0x2ac   :  { %526 = vrot.lane.b32.xlu2 %v2697_v19, %s2513_s0 }
 0x2b4   :  { %214 = vrot.lane.b32.xlu0 %v2663_v57, %s2516_s12 }
 0x2b6   :  { %281 = vrot.lane.b32.xlu1 %v2663_v57, %s3158_s20 }
 0x2bc   :  { %348 = vrot.lane.b32.xlu0 %v2663_v57, %s3145_s21 }
 0x2be   :  { %459 = vrot.lane.b32.xlu1 %v2697_v19, %s2512_s30 }
 0x2c4   :  { %374 = vrot.lane.b32.xlu0 %v2663_v57, %s3147_s22 }
 0x2c6   :  { %593 = vrot.lane.b32.xlu1 %v2697_v19, %s3152_s28 }
 0x2cc   :  { %524 = vrot.lane.b32.xlu0 %v2697_v19, %s2511_s29 }
 0x2ce   :  { %658 = vrot.lane.b32.xlu1 %v2697_v19, %s3147_s22  ;;  %s3173_s22 = smov 104  }
 0x2d4   :  { %591 = vrot.lane.b32.xlu0 %v2697_v19, %s3156_s19 }
 0x2ff   :  { %v205_v20 = vpop.xlane.xlu2 %204 }
 0x300   :  { %v206_v23 = vsub.f32 %v202_v7, %v205_v20 }
 0x302   :  { %v207_v25 = vmul.f32 1.442695, %v206_v23 }
 0x307   :  { %v377_v39 = vpop.permute.xlu2 %376 }
 0x30f   :  { %v527_v40 = vpop.permute.xlu2 %526 }
 0x310   :  { %v339_v21 = vpop.xlane.xlu1 %338 }
 0x311   :  { %v340_v22 = vsub.f32 %v336_v12, %v339_v21 }
 0x313   :  { %v341_v24 = vmul.f32 1.442695, %v340_v22  ;;  %v272_v26 = vpop.xlane.xlu0 %271 }
 0x314   :  { %v273_v28 = vsub.f32 %v269_v16, %v272_v26 }
 0x315   :  { %2387 = vpow2.f32 %v341_v24 }
 0x316   :  { %2389 = vpow2.f32 %v207_v25  ;;  %v274_v30 = vmul.f32 1.442695, %v273_v28 }
 0x318   :  { %2391 = vpow2.f32 %v274_v30 }
 0x31b   :  { %v2388_v27 = vpop.eup %2387 }
 0x31c   :  { %v343_v29 = vsel %vm176_vm8, %v2388_v27, 0.0  ;;  %v2390_v31 = vpop.eup %2389 }
 0x31d   :  { %344 = vadd.xlane.f32.xlu2 %v343_v29  ;;  %v209_v32 = vsel %vm176_vm8, %v2390_v31, 0.0 }
 0x31e   :  { %v2392_v35 = vpop.eup %2391 }
 0x31f   :  { %v276_v36 = vsel %vm176_vm8, %v2392_v35, 0.0 }
 0x325   :  { %210 = vadd.xlane.f32.xlu2 %v209_v32 }
 0x326   :  { %v215_v33 = vpop.permute.xlu0 %214 }
 0x327   :  { %235 = vmatpush.msra.mxu2 %v215_v33 }
 0x328   :  { %v282_v34 = vpop.permute.xlu1 %281 }
 0x329   :  { %302 = vmatpush.msrb.mxu2 %v282_v34 }
 0x32d   :  { %277 = vadd.xlane.f32.xlu2 %v276_v36 }
 0x32e   :  { %v349_v37 = vpop.permute.xlu0 %348 }
 0x32f   :  { %369 = vmatpush.msra.mxu3 %v349_v37 }
 0x330   :  { %v460_v38 = vpop.permute.xlu1 %459 }
 0x331   :  { %2092 = vmatpush.xpose.msk.msrb.mxu3 %vm176_vm8, %v460_v38 }
 0x336   :  { %v375_v42 = vpop.permute.xlu0 %374 }
 0x338   :  { %v594_v46 = vpop.permute.xlu1 %593 }
 0x33e   :  { %v525_v48 = vpop.permute.xlu0 %524 }
 0x340   :  { %v659_v55 = vpop.permute.xlu1 %658 }
 0x345   :  { %660 = vrot.lane.b32.xlu2 %v2697_v19, %s2515_s1 }
 0x346   :  { %v592_v53 = vpop.permute.xlu0 %591 }
 0x390   :  { %v345_v41 = vpop.xlane.xlu2 %344 }
 0x391   :  { %2393 = vrcp.f32 %v345_v41 }
 0x397   :  { %v2394_v43 = vpop.eup %2393 }
 0x398   :  { %v347_v44 = vmul.f32 %v2394_v43, %v2388_v27  ;;  %v211_v45 = vpop.xlane.xlu2 %210 }
 0x399   :  { %2395 = vrcp.f32 %v211_v45 }
 0x39a   :  { %2088 = vmatmul.msk.f32.vlgmr.msra.gmra.mxu3 %vm176_vm8, %v347_v44 }
 0x39b   :  { %2098 = vmatpush.xpose.msk.msra.mxu3 %vm176_vm8, %v594_v46 }
 0x39f   :  { %v2396_v47 = vpop.eup %2395 }
 0x3a0   :  { %v278_v49 = vpop.xlane.xlu2 %277  ;;  %v213_v50 = vmul.f32 %v2396_v47, %v2390_v31 }
 0x3a1   :  { %2397 = vrcp.f32 %v278_v49 }
 0x3a2   :  { %2082 = vmatmul.msk.f32.vlgmr.msra.gmra.mxu2 %vm176_vm8, %v213_v50  ;;  %2093 = vmatmul.msk.f32.vlgmr.msrb.gmra.mxu3 %vm176_vm8, %v2697_v19 }
 0x3a3   :  { %2089 = vmatpush.xpose.msk.msra.mxu2 %vm176_vm8, %v377_v39 }
 0x3a7   :  { %v2398_v51 = vpop.eup %2397 }
 0x3a8   :  { %v280_v52 = vmul.f32 %v2398_v51, %v2392_v35  ;;  %v661_v54 = vpop.permute.xlu2 %660 }
 0x3aa   :  { %2085 = vmatmul.msk.f32.vlgmr.msrb.gmra.mxu2 %vm176_vm8, %v280_v52  ;;  %2099 = vmatmul.msk.f32.vlgmr.msra.gmra.mxu3 %vm176_vm8, %v592_v53 }
 0x3ab   :  { %2095 = vmatpush.xpose.msk.msrb.mxu2 %vm176_vm8, %v527_v40 }
 0x3b2   :  { %2090 = vmatmul.msk.f32.vlgmr.msra.gmra.mxu2 %vm176_vm8, %v375_v42 }
 0x3b3   :  { %2101 = vmatpush.xpose.msk.msra.mxu2 %vm176_vm8, %v661_v54 }
 0x3ba   :  { %2096 = vmatmul.msk.f32.vlgmr.msrb.gmra.mxu2 %vm176_vm8, %v525_v48 }
 0x3c2   :  { %2102 = vmatmul.msk.f32.vlgmr.msra.gmra.mxu2 %vm176_vm8, %v659_v55 }
 0x41d   :  { %v2738_v56 = vpop.f32.mrf.mxu3 }
 0x425   :  { %v2740_v58 = vpop.f32.mrf.mxu2  ;;  %v482_v59 = vpop.f32.mrf.mxu3 }
 0x426   :  { %v485_v60 = vmul.f32 0.35355338, %v482_v59 }
 0x428   :  { %v486_v61 = vsel %vm2682_vm9, %v485_v60, -inf }
 0x429   :  { %v487_v62 = vsel %vm176_vm8, %v486_v61, -inf }
 0x42a   :  { %488 = vmax.xlane.f32.xlu0 %v487_v62 }
 0x42d   :  { %v2745_v63 = vpop.f32.mrf.mxu2  ;;  %v616_v2 = vpop.f32.mrf.mxu3 }
 0x42e   :  { %v619_v8 = vmul.f32 0.35355338, %v616_v2 }
 0x430   :  { %v620_v11 = vsel %vm2682_vm9, %v619_v8, -inf }
 0x431   :  { %v621_v15 = vsel %vm176_vm8, %v620_v11, -inf }
 0x435   :  { %v399_v0 = vpop.f32.mrf.mxu2 }
 0x436   :  { %v402_v1 = vmul.f32 0.35355338, %v399_v0 }
 0x438   :  { %v403_v6 = vsel %vm2682_vm9, %v402_v1, -inf }
 0x439   :  { %v404_v7 = vsel %vm176_vm8, %v403_v6, -inf }
 0x43a   :  { %405 = vmax.xlane.f32.xlu2 %v404_v7 }
 0x43d   :  { %v549_v9 = vpop.f32.mrf.mxu2 }
 0x43e   :  { %v552_v10 = vmul.f32 0.35355338, %v549_v9 }
 0x440   :  { %v553_v12 = vsel %vm2682_vm9, %v552_v10, -inf }
 0x441   :  { %v554_v14 = vsel %vm176_vm8, %v553_v12, -inf }
 0x442   :  { %555 = vmax.xlane.f32.xlu1 %v554_v14  ;;  %622 = vmax.xlane.f32.xlu2 %v621_v15 }
 0x445   :  { %v683_v16 = vpop.f32.mrf.mxu2 }
 0x446   :  { %v686_v17 = vmul.f32 0.35355338, %v683_v16  ;;  %v2290_v16 = vld [vmem:[%s3131_s7 + $0x8] sm:$0xff] }
 0x447   :  { %766 = vmatpush.bf16.msrb.mxu3 %v2290_v16 }
 0x448   :  { %v687_v18 = vsel %vm2682_vm9, %v686_v17, -inf }
 0x449   :  { %v688_v20 = vsel %vm176_vm8, %v687_v18, -inf }
 0x44a   :  { %689 = vmax.xlane.f32.xlu0 %v688_v20 }
 0x45b   :  { %415 = vrot.lane.b32.xlu1 %v2663_v57, %s3154_s2 }
 0x45e   :  { %498 = vrot.lane.b32.xlu0 %v2697_v19, %s2516_s12 }
 0x49d   :  { %v489_v21 = vpop.xlane.xlu0 %488 }
 0x49e   :  { %v490_v22 = vsub.f32 %v486_v61, %v489_v21 }
 0x4a0   :  { %v491_v23 = vmul.f32 1.442695, %v490_v22 }
 0x4a2   :  { %2399 = vpow2.f32 %v491_v23 }
 0x4a8   :  { %v2400_v24 = vpop.eup %2399 }
 0x4a9   :  { %v493_v25 = vsel %vm176_vm8, %v2400_v24, 0.0 }
 0x4aa   :  { %494 = vadd.xlane.f32.xlu2 %v493_v25 }
 0x4ad   :  { %v406_v26 = vpop.xlane.xlu2 %405 }
 0x4ae   :  { %v407_v27 = vsub.f32 %v403_v6, %v406_v26 }
 0x4b0   :  { %v408_v28 = vmul.f32 1.442695, %v407_v27 }
 0x4b2   :  { %2401 = vpow2.f32 %v408_v28 }
 0x4b5   :  { %v556_v29 = vpop.xlane.xlu1 %555  ;;  %v623_v30 = vpop.xlane.xlu2 %622 }
 0x4b6   :  { %v557_v31 = vsub.f32 %v553_v12, %v556_v29  ;;  %v624_v32 = vsub.f32 %v620_v11, %v623_v30 }
 0x4b8   :  { %v2402_v57 = vpop.eup %2401  ;;  %v558_v33 = vmul.f32 1.442695, %v557_v31  ;;  %v625_v34 = vmul.f32 1.442695, %v624_v32 }
 0x4b9   :  { %v410_v35 = vsel %vm176_vm8, %v2402_v57, 0.0 }
 0x4ba   :  { %2403 = vpow2.f32 %v558_v33  ;;  %411 = vadd.xlane.f32.xlu1 %v410_v35 }
 0x4bb   :  { %2405 = vpow2.f32 %v625_v34 }
 0x4bd   :  { %v690_v36 = vpop.xlane.xlu0 %689 }
 0x4be   :  { %v691_v37 = vsub.f32 %v687_v18, %v690_v36 }
 0x4c0   :  { %v2404_v38 = vpop.eup %2403  ;;  %v692_v39 = vmul.f32 1.442695, %v691_v37 }
 0x4c1   :  { %v2406_v40 = vpop.eup %2405  ;;  %v560_v41 = vsel %vm176_vm8, %v2404_v38, 0.0 }
 0x4c2   :  { %2407 = vpow2.f32 %v692_v39  ;;  %561 = vadd.xlane.f32.xlu0 %v560_v41  ;;  %v627_v42 = vsel %vm176_vm8, %v2406_v40, 0.0 }
 0x4c3   :  { %628 = vadd.xlane.f32.xlu2 %v627_v42 }
 0x4c8   :  { %v2408_v43 = vpop.eup %2407 }
 0x4c9   :  { %v694_v44 = vsel %vm176_vm8, %v2408_v43, 0.0 }
 0x4cb   :  { %695 = vadd.xlane.f32.xlu2 %v694_v44 }
 0x4cd   :  { %v416_v45 = vpop.permute.xlu1 %415 }
 0x4ce   :  { %436 = vmatpush.msrb.mxu1 %v416_v45 }
 0x4d0   :  { %v499_v46 = vpop.permute.xlu0 %498 }
 0x4d1   :  { %519 = vmatpush.msrb.mxu0 %v499_v46 }
 0x4d3   :  { %632 = vrot.lane.b32.xlu1 %v2697_v19, %s3145_s21 }
 0x4d6   :  { %699 = vrot.lane.b32.xlu0 %v2697_v19, %s3154_s2 }
 0x4e3   :  { %565 = vrot.lane.b32.xlu2 %v2697_v19, %s3158_s20  ;;  %s3168_s20 = sld [smem:[#allocation8_spill]] }
 0x51d   :  { %v495_v47 = vpop.xlane.xlu2 %494 }
 0x51e   :  { %2409 = vrcp.f32 %v495_v47 }
 0x524   :  { %v2410_v48 = vpop.eup %2409 }
 0x525   :  { %v497_v49 = vmul.f32 %v2410_v48, %v2400_v24  ;;  %v2292_v48 = vld [vmem:[%s3135_s11 + $0x8] sm:$0xff] }
 0x527   :  { %2094 = vmatmul.msk.f32.vlgmr.msrb.gmra.mxu0 %vm176_vm8, %v497_v49 }
 0x52d   :  { %v412_v50 = vpop.xlane.xlu1 %411 }
 0x52e   :  { %2411 = vrcp.f32 %v412_v50 }
 0x534   :  { %v2412_v51 = vpop.eup %2411 }
 0x535   :  { %v414_v52 = vmul.f32 %v2412_v51, %v2402_v57  ;;  %v562_v54 = vpop.xlane.xlu0 %561  ;;  %v2291_v51 = vld [vmem:[%s3135_s11] sm:$0xff] }
 0x536   :  { %v629_v53 = vpop.xlane.xlu2 %628 }
 0x537   :  { %2091 = vmatmul.msk.f32.vlgmr.msrb.gmra.mxu1 %vm176_vm8, %v414_v52  ;;  %2413 = vrcp.f32 %v629_v53 }
 0x538   :  { %2415 = vrcp.f32 %v562_v54 }
 0x53d   :  { %v2414_v59 = vpop.eup %2413 }
 0x53e   :  { %v696_v55 = vpop.xlane.xlu2 %695  ;;  %v2416_v60 = vpop.eup %2415  ;;  %v631_v19 = vmul.f32 %v2414_v59, %v2406_v40 }
 0x53f   :  { %2417 = vrcp.f32 %v696_v55  ;;  %v564_v62 = vmul.f32 %v2416_v60, %v2404_v38 }
 0x545   :  { %v633_v61 = vpop.permute.xlu1 %632  ;;  %v2418_v2 = vpop.eup %2417 }
 0x546   :  { %v566_v0 = vpop.permute.xlu2 %565  ;;  %653 = vmatpush.msra.mxu0 %v633_v61  ;;  %v698_v6 = vmul.f32 %v2418_v2, %v2408_v43 }
 0x547   :  { %586 = vmatpush.msra.mxu1 %v566_v0  ;;  %2100 = vmatmul.msk.f32.vlgmr.msra.gmra.mxu0 %vm176_vm8, %v631_v19 }
 0x548   :  { %2097 = vmatmul.msk.f32.vlgmr.msra.gmra.mxu1 %vm176_vm8, %v564_v62  ;;  %v700_v1 = vpop.permute.xlu0 %699 }
 0x549   :  { %720 = vmatpush.msrb.mxu1 %v700_v1 }
 0x54b   :  { %868 = vmatpush.bf16.msra.mxu1 %v2292_v48 }
 0x54f   :  { %869 = vmatpush.bf16.msra.mxu1 %v2291_v51 }
 0x550   :  { %2103 = vmatmul.msk.f32.vlgmr.msrb.gmra.mxu1 %vm176_vm8, %v698_v6 }
 0x5a4   :  { %v521_v7 = vpop.f32.mrf.mxu0 }
 0x5b4   :  { %v438_v8 = vpop.f32.mrf.mxu1 }
 0x5c4   :  { %v655_v9 = vpop.f32.mrf.mxu0 }
 0x5c5   :  { %v588_v10 = vpop.f32.mrf.mxu1  ;;  %v2333_v11 = vpack.i.bf16 %v655_v9, %v2738_v56  ;;  %v2289_v56 = vld [vmem:[%s3131_s7] sm:$0xff] }
 0x5c6   :  { %v2338_v12 = vpack.i.bf16 %v588_v10, %v2745_v63  ;;  %767 = vmatpush.bf16.msrb.mxu3 %v2289_v56  ;;  %v2367_v10 = vld [vmem:[%s3133_s9] ss:$0 sm:$0xff] }
 0x5c7   :  { %2334 = vrot.lane.b32.xlu0 %v2333_v11, %s3149_s23  ;;  %s3174_s23 = smov 48  }
 0x5c8   :  { %2339 = vrot.lane.b32.xlu1 %v2338_v12, %s3151_s24 }
 0x5cd   :  { %v722_v14 = vpop.f32.mrf.mxu1 }
 0x5ce   :  { %v2343_v15 = vpack.i.bf16 %v722_v14, %v438_v8 }
 0x5d0   :  { %2344 = vrot.lane.b32.xlu1 %v2343_v15, %s3150_s25  ;;  %v2368_v15 = vld [vmem:[%s3134_s10] ss:$0 sm:$0xff] }
 0x639   :  { %v2335_v17 = vpop.permute.xlu0 %2334 }
 0x63a   :  { %v2340_v63 = vpop.permute.xlu1 %2339  ;;  %v2337_v21 = vunpack.i.h.bf16 %v2335_v17  ;;  %v2336_v22 = vunpack.i.l.bf16 %v2335_v17 }
 0x63b   :  { %v2342_v18 = vunpack.i.h.bf16 %v2340_v63  ;;  %v2341_v20 = vunpack.i.l.bf16 %v2340_v63 }
 0x63d   :  { %v737_v23 = vsel %vm176_vm8, %v521_v7, %v2342_v18  ;;  %v453_v24 = vsel %vm176_vm8, %v2740_v58, %v2341_v20  ;;  %v2366_v58 = vld [vmem:[%s3132_s8] ss:$0 sm:$0xff] }
 0x63e   :  { %v455_v28 = vsel %vm454_vm10, %v453_v24, %v2336_v22  ;;  %v738_v29 = vsel %vm454_vm10, %v737_v23, %v2337_v21  ;;  %v2300_v21 = vld [vmem:[%s3137_s13 + $0x38] sm:$0xff]  ;;  %v2299_v22 = vld [vmem:[%s3137_s13 + $0x30] sm:$0xff]  ;;  %v2298_v23 = vld [vmem:[%s3137_s13 + $0x28] sm:$0xff] }
 0x63f   :  { %983 = vmatpush.bf16.msrb.mxu2 %v2300_v21  ;;  %v2297_v24 = vld [vmem:[%s3137_s13 + $0x20] sm:$0xff] }
 0x642   :  { %v2345_v25 = vpop.permute.xlu1 %2344 }
 0x643   :  { %v2347_v26 = vunpack.i.h.bf16 %v2345_v25  ;;  %v2346_v27 = vunpack.i.l.bf16 %v2345_v25  ;;  %984 = vmatpush.bf16.msrb.mxu2 %v2299_v22  ;;  %v2296_v25 = vld [vmem:[%s3137_s13 + $0x18] sm:$0xff] }
 0x644   :  { %v2302_v22 = vld [vmem:[%s3129_s5 + $0x18] sm:$0xff] }
 0x645   :  { %v739_v30 = vsel %vm456_vm11, %v738_v29, %v2347_v26  ;;  %v457_v31 = vsel %vm456_vm11, %v455_v28, %v2346_v27  ;;  %v2369_v26 = vld [vmem:[%s3168_s20] ss:$0 sm:$0xff]  ;;  %v2295_v28 = vld [vmem:[%s3137_s13 + $0x10] sm:$0xff]  ;;  %1095 = vmatpush.bf16.msrb.mxu1 %v2302_v22 }
 0x646   :  { %v744_v32 = vpack.c.bf16 %v739_v30, %v457_v31  ;;  %v2294_v31 = vld [vmem:[%s3137_s13 + $0x8] sm:$0xff] }
 0x647   :  { %985 = vmatpush.bf16.msrb.mxu2 %v2298_v23 }
 0x648   :  { %2112 = vmatmul.msk.bf16.vlgmr.msrb.gmra.mxu3 %vm73_vm0, %v744_v32 }
 0x64b   :  { %986 = vmatpush.bf16.msrb.mxu2 %v2297_v24 }
 0x64f   :  { %987 = vmatpush.bf16.msrb.mxu2 %v2296_v25  ;;  %v2301_v25 = vld [vmem:[%s3129_s5 + $0x10] sm:$0xff] }
 0x650   :  { %1096 = vmatpush.bf16.msrb.mxu1 %v2301_v25 }
 0x653   :  { %988 = vmatpush.bf16.msrb.mxu2 %v2295_v28 }
 0x657   :  { %989 = vmatpush.bf16.msrb.mxu2 %v2294_v31 }
 0x6cb   :  { %v769_v57 = vpop.f32.mrf.mxu3 }
 0x6cc   :  { %v774_v33 = vadd.f32 %v769_v57, %v2629_v3  ;;  %v2293_v57 = vld [vmem:[%s3137_s13] sm:$0xff] }
 0x6cd   :  { %990 = vmatpush.bf16.msrb.mxu2 %v2293_v57 }
 0x6ce   :  { %v2802_v34 = vadd.f32 %v2366_v58, %v774_v33 }
 0x6d0   :  { %v784_v35 = vsel %vm73_vm0, %v2802_v34, 0.0 }
 0x6d1   :  { %785 = vadd.xlane.f32.xlu0 %v784_v35 }
 0x6d3   :  { %v771_v36 = vpop.f32.mrf.mxu3 }
 0x6d4   :  { %v775_v37 = vadd.f32 %v771_v36, %v2633_v5 }
 0x6d6   :  { %v2807_v38 = vadd.f32 %v2366_v58, %v775_v37 }
 0x6d8   :  { %v787_v39 = vsel %vm73_vm0, %v2807_v38, 0.0 }
 0x6d9   :  { %788 = vadd.xlane.f32.xlu2 %v787_v39 }
 0x744   :  { %v786_v40 = vpop.xlane.xlu0 %785 }
 0x745   :  { %v790_v41 = vmul.f32 %v786_v40, %v2637_v13 }
 0x747   :  { %v792_v3 = vsub.f32 %v2802_v34, %v790_v41 }
 0x749   :  { %v794_v42 = vmul.f32 %v792_v3, %v792_v3 }
 0x74b   :  { %v796_v43 = vsel %vm73_vm0, %v794_v42, 0.0 }
 0x74c   :  { %797 = vadd.xlane.f32.xlu1 %v796_v43  ;;  %v789_v44 = vpop.xlane.xlu2 %788 }
 0x74d   :  { %v791_v45 = vmul.f32 %v789_v44, %v2637_v13 }
 0x74f   :  { %v793_v5 = vsub.f32 %v2807_v38, %v791_v45 }
 0x751   :  { %v795_v46 = vmul.f32 %v793_v5, %v793_v5 }
 0x753   :  { %v799_v47 = vsel %vm73_vm0, %v795_v46, 0.0 }
 0x754   :  { %800 = vadd.xlane.f32.xlu0 %v799_v47 }
 0x7bf   :  { %v798_v49 = vpop.xlane.xlu1 %797 }
 0x7c0   :  { %v802_v50 = vmul.f32 %v798_v49, %v2637_v13 }
 0x7c2   :  { %v804_v52 = vadd.f32 1e-05, %v802_v50 }
 0x7c4   :  { %2419 = vrsqrt.f32 %v804_v52  ;;  %vm812_vm13 = vweird.f32 %v804_v52 }
 0x7c7   :  { %v801_v53 = vpop.xlane.xlu0 %800 }
 0x7c8   :  { %v803_v54 = vmul.f32 %v801_v53, %v2637_v13 }
 0x7ca   :  { %v2420_v55 = vpop.eup %2419  ;;  %v805_v59 = vadd.f32 1e-05, %v803_v54 }
 0x7cb   :  { %v807_v60 = vmul.f32 %v2420_v55, %v804_v52  ;;  %vm813_vm12 = vweird.f32 %v2420_v55 }
 0x7cc   :  { %2421 = vrsqrt.f32 %v805_v59  ;;  %vm814_vm14 = vmor %vm812_vm13, %vm813_vm12  ;;  %vm822_vm1 = vweird.f32 %v805_v59 }
 0x7cd   :  { %v808_v19 = vmul.f32 %v2420_v55, %v807_v60 }
 0x7cf   :  { %v809_v61 = vmul.f32 0.5, %v808_v19 }
 0x7d1   :  { %v810_v62 = vsub.f32 1.5, %v809_v61 }
 0x7d2   :  { %v2422_v0 = vpop.eup %2421 }
 0x7d3   :  { %v811_v1 = vmul.f32 %v2420_v55, %v810_v62  ;;  %v817_v2 = vmul.f32 %v2422_v0, %v805_v59  ;;  %vm823_vm15 = vweird.f32 %v2422_v0 }
 0x7d4   :  { %vm824_vm2 = vmor %vm822_vm1, %vm823_vm15 }
 0x7d5   :  { %v818_v6 = vmul.f32 %v2422_v0, %v817_v2  ;;  %v815_v7 = vsel %vm814_vm14, %v2420_v55, %v811_v1  ;;  %v2370_v2 = vld [vmem:[%s3138_s14] ss:$0 sm:$0xff] }
 0x7d6   :  { %v826_v11 = vmul.f32 %v815_v7, %v792_v3 }
 0x7d7   :  { %v819_v8 = vmul.f32 0.5, %v818_v6 }
 0x7d8   :  { %v831_v16 = vmul.f32 %v2367_v10, %v826_v11 }
 0x7d9   :  { %v820_v9 = vsub.f32 1.5, %v819_v8 }
 0x7da   :  { %v836_v17 = vadd.f32 %v2368_v15, %v831_v16 }
 0x7db   :  { %v821_v12 = vmul.f32 %v2422_v0, %v820_v9 }
 0x7dd   :  { %v825_v14 = vsel %vm824_vm2, %v2422_v0, %v821_v12 }
 0x7de   :  { %v827_v56 = vmul.f32 %v825_v14, %v793_v5 }
 0x7e0   :  { %v832_v63 = vmul.f32 %v2367_v10, %v827_v56 }
 0x7e2   :  { %v837_v18 = vadd.f32 %v2368_v15, %v832_v63 }
 0x7e4   :  { %v842_v20 = vpack.c.bf16 %v837_v18, %v836_v17 }
 0x7e6   :  { %2121 = vmatmul.msk.bf16.vlgmr.msra.gmra.mxu1 %vm73_vm0, %v842_v20 }
 0x863   :  { %v871_v27 = vpop.f32.mrf.mxu1 }
 0x864   :  { %v872_v29 = vadd.f32 %v2369_v26, %v871_v27 }
 0x866   :  { %v2122_v30 = vmul.f32 -1.702, %v872_v29 }
 0x868   :  { %v880_v32 = vmul.f32 1.442695, %v2122_v30 }
 0x86a   :  { %2423 = vpow2.f32 %v880_v32 }
 0x86b   :  { %v873_v58 = vpop.f32.mrf.mxu1 }
 0x86c   :  { %v874_v33 = vadd.f32 %v2369_v26, %v873_v58 }
 0x86e   :  { %v2123_v35 = vmul.f32 -1.702, %v874_v33 }
 0x870   :  { %v2424_v36 = vpop.eup %2423  ;;  %v882_v37 = vmul.f32 1.442695, %v2123_v35 }
 0x871   :  { %v884_v39 = vadd.f32 1.0, %v2424_v36 }
 0x872   :  { %2425 = vpow2.f32 %v882_v37 }
 0x873   :  { %2427 = vrcp.f32 %v884_v39  ;;  %v897_v47 = vand.u32 2147483648, %v884_v39  ;;  %vm891_vm4 = vweird.f32 %v884_v39  ;;  %v895_v48 = vand.u32 2147483647, %v884_v39 }
 0x875   :  { %v898_v54 = vor.u32 1.1754944e-38, %v897_v47  ;;  %vm896_vm7 = vcmp.eq.f32.partialorder %v895_v48, 8.507059e+37 }
 0x878   :  { %v2426_v40 = vpop.eup %2425 }
 0x879   :  { %v2428_v41 = vpop.eup %2427  ;;  %v885_v3 = vadd.f32 1.0, %v2426_v40 }
 0x87a   :  { %v887_v42 = vmul.f32 %v2428_v41, %v884_v39  ;;  %vm892_vm3 = vweird.f32 %v2428_v41 }
 0x87b   :  { %2429 = vrcp.f32 %v885_v3  ;;  %vm893_vm5 = vmor %vm891_vm4, %vm892_vm3  ;;  %v912_v50 = vand.u32 2147483648, %v885_v3  ;;  %v910_v53 = vand.u32 2147483647, %v885_v3  ;;  %vm906_vm12 = vweird.f32 %v885_v3 }
 0x87c   :  { %v888_v43 = vsub.f32 1.0, %v887_v42 }
 0x87d   :  { %v913_v60 = vor.u32 1.1754944e-38, %v912_v50  ;;  %vm911_vm14 = vcmp.eq.f32.partialorder %v910_v53, 8.507059e+37 }
 0x87e   :  { %v889_v44 = vmul.f32 %v2428_v41, %v888_v43 }
 0x880   :  { %v890_v5 = vadd.f32 %v2428_v41, %v889_v44 }
 0x881   :  { %v2430_v45 = vpop.eup %2429 }
 0x882   :  { %v902_v46 = vmul.f32 %v2430_v45, %v885_v3  ;;  %v894_v51 = vsel %vm893_vm5, %v2428_v41, %v890_v5  ;;  %vm907_vm6 = vweird.f32 %v2430_v45  ;;  %v2371_v3 = vld [vmem:[%s3127_s3 + $0x1] ss:$0 sm:$0xff]  ;;  %s3169_s3 = smov 56  }
 0x883   :  { %v899_v59 = vsel %vm896_vm7, %v898_v54, %v894_v51  ;;  %vm908_vm13 = vmor %vm906_vm12, %vm907_vm6  ;;  %v2373_v51 = vld [vmem:[%s3130_s6 + $0x1] ss:$0 sm:$0xff]  ;;  %s3171_s6 = smov 40  }
 0x884   :  { %v903_v49 = vsub.f32 1.0, %v902_v46  ;;  %v916_v62 = vmul.f32 %v899_v59, %v872_v29 }
 0x886   :  { %v904_v52 = vmul.f32 %v2430_v45, %v903_v49 }
 0x888   :  { %v905_v55 = vadd.f32 %v2430_v45, %v904_v52 }
 0x88a   :  { %v909_v19 = vsel %vm908_vm13, %v2430_v45, %v905_v55  ;;  %v2372_v45 = vld [vmem:[%s3128_s4 + $0x1] ss:$0 sm:$0xff]  ;;  %s3170_s4 = smov 112  }
 0x88b   :  { %v914_v61 = vsel %vm911_vm14, %v913_v60, %v909_v19 }
 0x88c   :  { %v917_v0 = vmul.f32 %v914_v61, %v874_v33 }
 0x88e   :  { %v934_v1 = vpack.c.bf16 %v917_v0, %v916_v62 }
 0x890   :  { %991 = vmatmul.bf16.vlgmr.msrb.gmra.mxu2 %v934_v1 }
 0x913   :  { %v992_v6 = vpop.f32.mrf.mxu2 }
 0x914   :  { %v997_v7 = vadd.f32 %v992_v6, %v2802_v34 }
 0x916   :  { %v2863_v8 = vadd.f32 %v2370_v2, %v997_v7 }
 0x918   :  { %v1009_v9 = vsel %vm73_vm0, %v2863_v8, 0.0 }
 0x919   :  { %1010 = vadd.xlane.f32.xlu2 %v1009_v9 }
 0x91b   :  { %v994_v10 = vpop.f32.mrf.mxu2 }
 0x91c   :  { %v998_v11 = vadd.f32 %v994_v10, %v2807_v38 }
 0x91e   :  { %v2868_v12 = vadd.f32 %v2370_v2, %v998_v11 }
 0x920   :  { %v1012_v14 = vsel %vm73_vm0, %v2868_v12, 0.0 }
 0x921   :  { %1013 = vadd.xlane.f32.xlu1 %v1012_v14 }
 0x98c   :  { %v1011_v15 = vpop.xlane.xlu2 %1010 }
 0x98d   :  { %v1015_v16 = vmul.f32 %v1011_v15, %v2637_v13 }
 0x98f   :  { %v1017_v34 = vsub.f32 %v2863_v8, %v1015_v16 }
 0x991   :  { %v1019_v56 = vmul.f32 %v1017_v34, %v1017_v34 }
 0x993   :  { %v1021_v63 = vsel %vm73_vm0, %v1019_v56, 0.0 }
 0x994   :  { %1022 = vadd.xlane.f32.xlu0 %v1021_v63  ;;  %v1014_v17 = vpop.xlane.xlu1 %1013 }
 0x995   :  { %v1016_v18 = vmul.f32 %v1014_v17, %v2637_v13 }
 0x997   :  { %v1018_v38 = vsub.f32 %v2868_v12, %v1016_v18 }
 0x999   :  { %v1020_v20 = vmul.f32 %v1018_v38, %v1018_v38 }
 0x99b   :  { %v1024_v21 = vsel %vm73_vm0, %v1020_v20, 0.0 }
 0x99c   :  { %1025 = vadd.xlane.f32.xlu2 %v1024_v21 }
 0xa07   :  { %v1023_v23 = vpop.xlane.xlu0 %1022 }
 0xa08   :  { %v1027_v24 = vmul.f32 %v1023_v23, %v2637_v13 }
 0xa0a   :  { %v1029_v26 = vadd.f32 1e-05, %v1027_v24 }
 0xa0c   :  { %2431 = vrsqrt.f32 %v1029_v26  ;;  %vm1037_vm1 = vweird.f32 %v1029_v26 }
 0xa0f   :  { %v1026_v27 = vpop.xlane.xlu2 %1025 }
 0xa10   :  { %v1028_v28 = vmul.f32 %v1026_v27, %v2637_v13 }
 0xa12   :  { %v2432_v29 = vpop.eup %2431  ;;  %v1030_v30 = vadd.f32 1e-05, %v1028_v28 }
 0xa13   :  { %v1032_v31 = vmul.f32 %v2432_v29, %v1029_v26  ;;  %vm1038_vm15 = vweird.f32 %v2432_v29 }
 0xa14   :  { %2433 = vrsqrt.f32 %v1030_v30  ;;  %vm1039_vm2 = vmor %vm1037_vm1, %vm1038_vm15  ;;  %vm1047_vm4 = vweird.f32 %v1030_v30 }
 0xa15   :  { %v1033_v32 = vmul.f32 %v2432_v29, %v1032_v31 }
 0xa17   :  { %v1034_v58 = vmul.f32 0.5, %v1033_v32 }
 0xa19   :  { %v1035_v57 = vsub.f32 1.5, %v1034_v58 }
 0xa1a   :  { %v2434_v33 = vpop.eup %2433 }
 0xa1b   :  { %v1036_v35 = vmul.f32 %v2432_v29, %v1035_v57  ;;  %v1042_v36 = vmul.f32 %v2434_v33, %v1030_v30  ;;  %vm1048_vm3 = vweird.f32 %v2434_v33 }
 0xa1c   :  { %vm1049_vm5 = vmor %vm1047_vm4, %vm1048_vm3 }
 0xa1d   :  { %v1043_v37 = vmul.f32 %v2434_v33, %v1042_v36  ;;  %v1040_v39 = vsel %vm1039_vm2, %v2432_v29, %v1036_v35 }
 0xa1e   :  { %v1051_v42 = vmul.f32 %v1040_v39, %v1017_v34 }
 0xa1f   :  { %v1044_v40 = vmul.f32 0.5, %v1043_v37 }
 0xa20   :  { %v1056_v5 = vmul.f32 %v2371_v3, %v1051_v42 }
 0xa21   :  { %v1045_v41 = vsub.f32 1.5, %v1044_v40 }
 0xa22   :  { %v1061_v48 = vadd.f32 %v2372_v45, %v1056_v5 }
 0xa23   :  { %v1046_v43 = vmul.f32 %v2434_v33, %v1045_v41 }
 0xa25   :  { %v1050_v44 = vsel %vm1049_vm5, %v2434_v33, %v1046_v43 }
 0xa26   :  { %v1052_v46 = vmul.f32 %v1050_v44, %v1018_v38 }
 0xa28   :  { %v1057_v47 = vmul.f32 %v2371_v3, %v1052_v46 }
 0xa2a   :  { %v1062_v49 = vadd.f32 %v2372_v45, %v1057_v47 }
 0xa2c   :  { %v1068_v50 = vpack.c.bf16 %v1062_v49, %v1061_v48 }
 0xa2e   :  { %2171 = vmatmul.msk.bf16.vlgmr.msrb.gmra.mxu1 %vm73_vm0, %v1068_v50 }
 0xaab   :  { %v1098_v52 = vpop.f32.mrf.mxu1 }
 0xaac   :  { %v2896_v53 = vadd.f32 %v2373_v51, %v1098_v52 }
 0xaae   :  { %1169 = vrot.lane.b32.xlu2 %v2896_v53, %s2511_s29  ;;  %1171 = vrot.lane.b32.xlu0 %v2896_v53, %s2513_s0 }
 0xaaf   :  { %1104 = vrot.lane.b32.xlu1 %v2896_v53, %s2512_s30 }
 0xab3   :  { %v1100_v54 = vpop.f32.mrf.mxu1 }
 0xab4   :  { %v2904_v55 = vadd.f32 %v2373_v51, %v1100_v54 }
 0xab6   :  { %1143 = vrot.lane.b32.xlu2 %v2896_v53, %s2516_s12 }
 0xb08   :  { %v1170_v59 = vpop.permute.xlu2 %1169 }
 0xb10   :  { %v1144_v60 = vpop.permute.xlu2 %1143 }
 0xb11   :  { %1164 = vmatpush.msrb.mxu0 %v1144_v60 }
 0xb20   :  { %v1172_v19 = vpop.permute.xlu0 %1171 }
 0xb21   :  { %v1105_v61 = vpop.permute.xlu1 %1104  ;;  %2175 = vmatpush.xpose.msk.msra.mxu1 %vm176_vm8, %v1172_v19 }
 0xb22   :  { %2172 = vmatpush.xpose.msk.msra.mxu3 %vm176_vm8, %v1105_v61 }
 0xb24   :  { %2176 = vmatmul.msk.f32.vlgmr.msra.gmra.mxu1 %vm176_vm8, %v1170_v59 }
 0xb25   :  { %2173 = vmatmul.msk.f32.vlgmr.msra.gmra.mxu3 %vm176_vm8, %v2896_v53 }
 0xba1   :  { %v1194_v62 = vpop.f32.mrf.mxu1 }
 0xba2   :  { %v1197_v0 = vmul.f32 0.35355338, %v1194_v62 }
 0xba4   :  { %v1198_v1 = vsel %vm2682_vm9, %v1197_v0, -inf }
 0xba5   :  { %v1199_v2 = vsel %vm176_vm8, %v1198_v1, -inf }
 0xba6   :  { %1200 = vmax.xlane.f32.xlu0 %v1199_v2 }
 0xba8   :  { %v1127_v6 = vpop.f32.mrf.mxu3 }
 0xba9   :  { %v1130_v7 = vmul.f32 0.35355338, %v1127_v6 }
 0xbab   :  { %v1131_v9 = vsel %vm2682_vm9, %v1130_v7, -inf }
 0xbac   :  { %v1132_v10 = vsel %vm176_vm8, %v1131_v9, -inf }
 0xbad   :  { %1133 = vmax.xlane.f32.xlu1 %v1132_v10 }
 0xbba   :  { %1305 = vrot.lane.b32.xlu0 %v2896_v53, %s2515_s1 }
 0xbc6   :  { %1210 = vrot.lane.b32.xlu1 %v2896_v53, %s3169_s3 }
 0xbce   :  { %1236 = vrot.lane.b32.xlu1 %v2896_v53, %s3170_s4 }
 0xbd6   :  { %1344 = vrot.lane.b32.xlu1 %v2896_v53, %s3171_s6 }
 0xbde   :  { %1451 = vrot.lane.b32.xlu1 %v2904_v55, %s2511_s29  ;;  %s3172_s29 = smov 80  }
 0xc19   :  { %v1201_v11 = vpop.xlane.xlu0 %1200 }
 0xc1a   :  { %v1202_v14 = vsub.f32 %v1198_v1, %v1201_v11 }
 0xc1c   :  { %v1203_v15 = vmul.f32 1.442695, %v1202_v14 }
 0xc1e   :  { %2435 = vpow2.f32 %v1203_v15 }
 0xc20   :  { %v1134_v16 = vpop.xlane.xlu1 %1133 }
 0xc21   :  { %v1135_v34 = vsub.f32 %v1131_v9, %v1134_v16 }
 0xc23   :  { %v1136_v56 = vmul.f32 1.442695, %v1135_v34 }
 0xc24   :  { %v2436_v63 = vpop.eup %2435 }
 0xc25   :  { %2437 = vpow2.f32 %v1136_v56  ;;  %v1205_v17 = vsel %vm176_vm8, %v2436_v63, 0.0 }
 0xc26   :  { %1206 = vadd.xlane.f32.xlu2 %v1205_v17 }
 0xc2b   :  { %v2438_v18 = vpop.eup %2437 }
 0xc2c   :  { %v1138_v38 = vsel %vm176_vm8, %v2438_v18, 0.0  ;;  %v1306_v21 = vpop.permute.xlu0 %1305 }
 0xc2d   :  { %1139 = vadd.xlane.f32.xlu0 %v1138_v38 }
 0xc38   :  { %v1211_v20 = vpop.permute.xlu1 %1210 }
 0xc39   :  { %1231 = vmatpush.msrb.mxu3 %v1211_v20 }
 0xc3b   :  { %2181 = vmatpush.xpose.msk.msra.mxu3 %vm176_vm8, %v1306_v21 }
 0xc3e   :  { %1238 = vrot.lane.b32.xlu2 %v2896_v53, %s3172_s29 }
 0xc40   :  { %v1237_v24 = vpop.permute.xlu1 %1236 }
 0xc41   :  { %1303 = vrot.lane.b32.xlu0 %v2896_v53, %s3173_s22 }
 0xc48   :  { %v1345_v30 = vpop.permute.xlu1 %1344 }
 0xc99   :  { %v1207_v22 = vpop.xlane.xlu2 %1206 }
 0xc9a   :  { %2439 = vrcp.f32 %v1207_v22 }
 0xca0   :  { %v2440_v23 = vpop.eup %2439  ;;  %v1140_v25 = vpop.xlane.xlu0 %1139 }
 0xca1   :  { %v1209_v26 = vmul.f32 %v2440_v23, %v2436_v63  ;;  %2441 = vrcp.f32 %v1140_v25  ;;  %v1239_v27 = vpop.permute.xlu2 %1238 }
 0xca2   :  { %2178 = vmatpush.xpose.msk.msra.mxu0 %vm176_vm8, %v1239_v27 }
 0xca3   :  { %2177 = vmatmul.msk.f32.vlgmr.msrb.gmra.mxu3 %vm176_vm8, %v1209_v26 }
 0xca7   :  { %v2442_v28 = vpop.eup %2441 }
 0xca8   :  { %v1142_v29 = vmul.f32 %v2442_v28, %v2438_v18 }
 0xcaa   :  { %2174 = vmatmul.msk.f32.vlgmr.msrb.gmra.mxu0 %vm176_vm8, %v1142_v29 }
 0xcab   :  { %1365 = vmatpush.msrb.mxu0 %v1345_v30 }
 0xcb2   :  { %2179 = vmatmul.msk.f32.vlgmr.msra.gmra.mxu0 %vm176_vm8, %v1237_v24 }
 0xcb3   :  { %v1304_v31 = vpop.permute.xlu0 %1303 }
 0xcb4   :  { %2182 = vmatmul.msk.f32.vlgmr.msra.gmra.mxu3 %vm176_vm8, %v1304_v31 }
 0xd26   :  { %v2943_v58 = vpop.f32.mrf.mxu3 }
 0xd27   :  { %v2941_v32 = vpop.f32.mrf.mxu0 }
 0xd2f   :  { %v1261_v57 = vpop.f32.mrf.mxu0 }
 0xd30   :  { %v1264_v33 = vmul.f32 0.35355338, %v1261_v57 }
 0xd32   :  { %v1265_v35 = vsel %vm2682_vm9, %v1264_v33, -inf }
 0xd33   :  { %v1266_v36 = vsel %vm176_vm8, %v1265_v35, -inf }
 0xd34   :  { %1267 = vmax.xlane.f32.xlu0 %v1266_v36 }
 0xd37   :  { %v1328_v37 = vpop.f32.mrf.mxu3 }
 0xd38   :  { %v1331_v39 = vmul.f32 0.35355338, %v1328_v37 }
 0xd3a   :  { %v1332_v40 = vsel %vm2682_vm9, %v1331_v39, -inf }
 0xd3b   :  { %v1333_v41 = vsel %vm176_vm8, %v1332_v40, -inf }
 0xd3c   :  { %1334 = vmax.xlane.f32.xlu2 %v1333_v41 }
 0xd48   :  { %1277 = vrot.lane.b32.xlu0 %v2896_v53, %s3174_s23  ;;  %v1452_v53 = vpop.permute.xlu1 %1451 }
 0xd50   :  { %1453 = vrot.lane.b32.xlu0 %v2904_v55, %s2513_s0  ;;  %s3176_s0 = smov 24  }
 0xd54   :  { %1386 = vrot.lane.b32.xlu2 %v2904_v55, %s2512_s30  ;;  %s3175_s30 = smov 8  }
 0xd58   :  { %1520 = vrot.lane.b32.xlu0 %v2904_v55, %s3172_s29 }
 0xd60   :  { %1585 = vrot.lane.b32.xlu0 %v2904_v55, %s3173_s22 }
 0xda7   :  { %v1268_v3 = vpop.xlane.xlu0 %1267 }
 0xda8   :  { %v1269_v42 = vsub.f32 %v1265_v35, %v1268_v3 }
 0xdaa   :  { %v1270_v43 = vmul.f32 1.442695, %v1269_v42 }
 0xdac   :  { %2443 = vpow2.f32 %v1270_v43 }
 0xdaf   :  { %v1335_v44 = vpop.xlane.xlu2 %1334 }
 0xdb0   :  { %v1336_v45 = vsub.f32 %v1332_v40, %v1335_v44 }
 0xdb2   :  { %v2444_v5 = vpop.eup %2443  ;;  %v1337_v46 = vmul.f32 1.442695, %v1336_v45 }
 0xdb3   :  { %v1272_v47 = vsel %vm176_vm8, %v2444_v5, 0.0 }
 0xdb4   :  { %2445 = vpow2.f32 %v1337_v46  ;;  %1273 = vadd.xlane.f32.xlu1 %v1272_v47 }
 0xdb7   :  { %v1387_v50 = vpop.permute.xlu2 %1386 }
 0xdba   :  { %v2446_v48 = vpop.eup %2445  ;;  %v1278_v49 = vpop.permute.xlu0 %1277 }
 0xdbb   :  { %1298 = vmatpush.msrb.mxu1 %v1278_v49  ;;  %v1339_v51 = vsel %vm176_vm8, %v2446_v48, 0.0 }
 0xdbc   :  { %1340 = vadd.xlane.f32.xlu2 %v1339_v51 }
 0xdbd   :  { %2184 = vmatpush.xpose.msk.msra.mxu1 %vm176_vm8, %v1387_v50 }
 0xdc2   :  { %v1454_v52 = vpop.permute.xlu0 %1453 }
 0xdc3   :  { %2187 = vmatpush.xpose.msk.msra.mxu0 %vm176_vm8, %v1454_v52 }
 0xdca   :  { %v1521_v61 = vpop.permute.xlu0 %1520 }
 0xdcd   :  { %1518 = vrot.lane.b32.xlu1 %v2904_v55, %s3170_s4 }
 0xdd2   :  { %v1586_v6 = vpop.permute.xlu0 %1585 }
 0xdd4   :  { %1587 = vrot.lane.b32.xlu2 %v2904_v55, %s2515_s1  ;;  %s3177_s1 = smov 16  }
 0xe27   :  { %v1274_v54 = vpop.xlane.xlu1 %1273 }
 0xe28   :  { %2447 = vrcp.f32 %v1274_v54 }
 0xe2e   :  { %v2448_v59 = vpop.eup %2447 }
 0xe2f   :  { %v1276_v60 = vmul.f32 %v2448_v59, %v2444_v5  ;;  %v1341_v19 = vpop.xlane.xlu2 %1340 }
 0xe30   :  { %2449 = vrcp.f32 %v1341_v19 }
 0xe31   :  { %2180 = vmatmul.msk.f32.vlgmr.msrb.gmra.mxu1 %vm176_vm8, %v1276_v60 }
 0xe32   :  { %2190 = vmatpush.xpose.msk.msrb.mxu1 %vm176_vm8, %v1521_v61 }
 0xe36   :  { %v2450_v62 = vpop.eup %2449 }
 0xe37   :  { %v1343_v0 = vmul.f32 %v2450_v62, %v2446_v48  ;;  %v1588_v1 = vpop.permute.xlu2 %1587 }
 0xe39   :  { %2183 = vmatmul.msk.f32.vlgmr.msrb.gmra.mxu0 %vm176_vm8, %v1343_v0  ;;  %2185 = vmatmul.msk.f32.vlgmr.msra.gmra.mxu1 %vm176_vm8, %v2904_v55 }
 0xe3a   :  { %2193 = vmatpush.xpose.msk.msrb.mxu0 %vm176_vm8, %v1588_v1 }
 0xe3f   :  { %v1519_v2 = vpop.permute.xlu1 %1518 }
 0xe41   :  { %2188 = vmatmul.msk.f32.vlgmr.msra.gmra.mxu0 %vm176_vm8, %v1452_v53  ;;  %2191 = vmatmul.msk.f32.vlgmr.msrb.gmra.mxu1 %vm176_vm8, %v1519_v2 }
 0xe49   :  { %2194 = vmatmul.msk.f32.vlgmr.msrb.gmra.mxu0 %vm176_vm8, %v1586_v6 }
 0xeae   :  { %v2978_v7 = vpop.f32.mrf.mxu1 }
 0xeb6   :  { %v2980_v9 = vpop.f32.mrf.mxu0  ;;  %v1409_v10 = vpop.f32.mrf.mxu1 }
 0xeb7   :  { %v1412_v11 = vmul.f32 0.35355338, %v1409_v10 }
 0xeb9   :  { %v1413_v14 = vsel %vm2682_vm9, %v1412_v11, -inf }
 0xeba   :  { %v1414_v15 = vsel %vm176_vm8, %v1413_v14, -inf }
 0xebb   :  { %1415 = vmax.xlane.f32.xlu2 %v1414_v15 }
 0xebe   :  { %v1476_v16 = vpop.f32.mrf.mxu0  ;;  %v1543_v34 = vpop.f32.mrf.mxu1 }
 0xebf   :  { %v1479_v56 = vmul.f32 0.35355338, %v1476_v16  ;;  %v1546_v63 = vmul.f32 0.35355338, %v1543_v34 }
 0xec1   :  { %v1480_v17 = vsel %vm2682_vm9, %v1479_v56, -inf  ;;  %v1547_v18 = vsel %vm2682_vm9, %v1546_v63, -inf }
 0xec2   :  { %v1481_v38 = vsel %vm176_vm8, %v1480_v17, -inf  ;;  %v1548_v20 = vsel %vm176_vm8, %v1547_v18, -inf }
 0xec3   :  { %1482 = vmax.xlane.f32.xlu1 %v1481_v38  ;;  %1549 = vmax.xlane.f32.xlu0 %v1548_v20 }
 0xec6   :  { %v1610_v21 = vpop.f32.mrf.mxu0 }
 0xec7   :  { %v1613_v22 = vmul.f32 0.35355338, %v1610_v21 }
 0xec9   :  { %v1614_v23 = vsel %vm2682_vm9, %v1613_v22, -inf }
 0xeca   :  { %v1615_v24 = vsel %vm176_vm8, %v1614_v23, -inf }
 0xecb   :  { %1616 = vmax.xlane.f32.xlu2 %v1615_v24 }
 0xedc   :  { %1425 = vrot.lane.b32.xlu1 %v2904_v55, %s2516_s12 }
 0xf2e   :  { %v1416_v25 = vpop.xlane.xlu2 %1415 }
 0xf2f   :  { %v1417_v26 = vsub.f32 %v1413_v14, %v1416_v25  ;;  %v2304_v14 = vld [vmem:[%s3131_s7 + $0x18] sm:$0xff] }
 0xf30   :  { %1694 = vmatpush.bf16.msra.mxu1 %v2304_v14 }
 0xf31   :  { %v1418_v27 = vmul.f32 1.442695, %v1417_v26  ;;  %v2374_v26 = vld [vmem:[%s3132_s8 + $0x1] ss:$0 sm:$0xff] }
 0xf33   :  { %2451 = vpow2.f32 %v1418_v27 }
 0xf36   :  { %v1550_v28 = vpop.xlane.xlu0 %1549  ;;  %v1483_v29 = vpop.xlane.xlu1 %1482 }
 0xf37   :  { %v1551_v30 = vsub.f32 %v1547_v18, %v1550_v28  ;;  %v1484_v31 = vsub.f32 %v1480_v17, %v1483_v29 }
 0xf39   :  { %v2452_v57 = vpop.eup %2451  ;;  %v1552_v33 = vmul.f32 1.442695, %v1551_v30  ;;  %v1485_v35 = vmul.f32 1.442695, %v1484_v31 }
 0xf3a   :  { %v1420_v4 = vsel %vm176_vm8, %v2452_v57, 0.0 }
 0xf3b   :  { %2453 = vpow2.f32 %v1552_v33  ;;  %1421 = vadd.xlane.f32.xlu1 %v1420_v4 }
 0xf3c   :  { %2455 = vpow2.f32 %v1485_v35 }
 0xf3e   :  { %v1617_v36 = vpop.xlane.xlu2 %1616 }
 0xf3f   :  { %v1618_v37 = vsub.f32 %v1614_v23, %v1617_v36 }
 0xf41   :  { %v2454_v39 = vpop.eup %2453  ;;  %v1619_v40 = vmul.f32 1.442695, %v1618_v37 }
 0xf42   :  { %v2456_v41 = vpop.eup %2455  ;;  %v1554_v3 = vsel %vm176_vm8, %v2454_v39, 0.0 }
 0xf43   :  { %2457 = vpow2.f32 %v1619_v40  ;;  %1555 = vadd.xlane.f32.xlu2 %v1554_v3  ;;  %v1487_v42 = vsel %vm176_vm8, %v2456_v41, 0.0 }
 0xf44   :  { %1488 = vadd.xlane.f32.xlu0 %v1487_v42  ;;  %v2306_v42 = vld [vmem:[%s3135_s11 + $0x18] sm:$0xff] }
 0xf49   :  { %v2458_v43 = vpop.eup %2457 }
 0xf4a   :  { %v1621_v44 = vsel %vm176_vm8, %v2458_v43, 0.0 }
 0xf4c   :  { %1622 = vadd.xlane.f32.xlu0 %v1621_v44 }
 0xf4e   :  { %v1426_v45 = vpop.permute.xlu1 %1425 }
 0xf4f   :  { %1446 = vmatpush.msrb.mxu3 %v1426_v45  ;;  %v2305_v45 = vld [vmem:[%s3135_s11 + $0x10] sm:$0xff] }
 0xf54   :  { %1626 = vrot.lane.b32.xlu1 %v2904_v55, %s3171_s6 }
 0xf5b   :  { %1492 = vrot.lane.b32.xlu2 %v2904_v55, %s3169_s3  ;;  %s3178_s3 = sld [smem:[#allocation7_spill]] }
 0xf60   :  { %1559 = vrot.lane.b32.xlu0 %v2904_v55, %s3174_s23  ;;  %s2062_s23 = sshll.u32 %s3142_s18, 4  ;;  %s2063_s23 = int_to_ptr.hbm [resolvable:$true] %s2062_s23 }
 0xfae   :  { %v1422_v5 = vpop.xlane.xlu1 %1421 }
 0xfaf   :  { %2459 = vrcp.f32 %v1422_v5 }
 0xfb5   :  { %v2460_v46 = vpop.eup %2459 }
 0xfb6   :  { %v1424_v47 = vmul.f32 %v2460_v46, %v2452_v57  ;;  %v1556_v48 = vpop.xlane.xlu2 %1555 }
 0xfb7   :  { %v1489_v49 = vpop.xlane.xlu0 %1488 }
 0xfb8   :  { %2461 = vrcp.f32 %v1489_v49  ;;  %2186 = vmatmul.msk.f32.vlgmr.msrb.gmra.mxu3 %vm176_vm8, %v1424_v47 }
 0xfbe   :  { %v2462_v50 = vpop.eup %2461  ;;  %v1493_v51 = vpop.permute.xlu2 %1492 }
 0xfbf   :  { %v1491_v52 = vmul.f32 %v2462_v50, %v2456_v41  ;;  %v1623_v53 = vpop.xlane.xlu0 %1622  ;;  %1513 = vmatpush.msra.mxu2 %v1493_v51 }
 0xfc0   :  { %2463 = vrcp.f32 %v1623_v53 }
 0xfc1   :  { %2189 = vmatmul.msk.f32.vlgmr.msra.gmra.mxu2 %vm176_vm8, %v1491_v52  ;;  %2465 = vrcp.f32 %v1556_v48 }
 0xfc6   :  { %v2464_v54 = vpop.eup %2463  ;;  %v1627_v59 = vpop.permute.xlu1 %1626 }
 0xfc7   :  { %v1625_v55 = vmul.f32 %v2464_v54, %v2458_v43  ;;  %1647 = vmatpush.msrb.mxu2 %v1627_v59  ;;  %v2466_v60 = vpop.eup %2465 }
 0xfc8   :  { %v1558_v19 = vmul.f32 %v2466_v60, %v2454_v39 }
 0xfc9   :  { %2195 = vmatmul.msk.f32.vlgmr.msrb.gmra.mxu2 %vm176_vm8, %v1625_v55 }
 0xfd2   :  { %v1560_v61 = vpop.permute.xlu0 %1559 }
 0xfd3   :  { %1580 = vmatpush.msra.mxu3 %v1560_v61 }
 0xfd4   :  { %2192 = vmatmul.msk.f32.vlgmr.msra.gmra.mxu3 %vm176_vm8, %v1558_v19 }
 0xfd5   :  { %1801 = vmatpush.bf16.msrb.mxu3 %v2306_v42 }
 0xfd9   :  { %1802 = vmatpush.bf16.msrb.mxu3 %v2305_v45 }
0x103b   :  { %v1448_v6 = vpop.f32.mrf.mxu3 }
0x1044   :  { %v1515_v62 = vpop.f32.mrf.mxu2 }
0x1045   :  { %v2348_v0 = vpack.i.bf16 %v1515_v62, %v2943_v58  ;;  %v2303_v58 = vld [vmem:[%s3131_s7 + $0x10] sm:$0xff] }
0x1046   :  { %1695 = vmatpush.bf16.msra.mxu1 %v2303_v58 }
0x1047   :  { %2349 = vrot.lane.b32.xlu2 %v2348_v0, %s3175_s30  ;;  %v2375_v0 = vld [vmem:[%s3133_s9 + $0x1] ss:$0 sm:$0xff] }
0x104c   :  { %v1649_v1 = vpop.f32.mrf.mxu2 }
0x104d   :  { %v2358_v2 = vpack.i.bf16 %v1649_v1, %v2980_v9 }
0x104f   :  { %2359 = vrot.lane.b32.xlu1 %v2358_v2, %s3176_s0 }
0x1057   :  { %v1582_v10 = vpop.f32.mrf.mxu3 }
0x1058   :  { %v2353_v11 = vpack.i.bf16 %v1582_v10, %v2978_v7  ;;  %v2376_v10 = vld [vmem:[%s3134_s10 + $0x1] ss:$0 sm:$0xff] }
0x105a   :  { %2354 = vrot.lane.b32.xlu0 %v2353_v11, %s3177_s1 }
0x10a1   :  { %v2350_v15 = vpop.permute.xlu2 %2349 }
0x10a2   :  { %v2352_v9 = vunpack.i.h.bf16 %v2350_v15  ;;  %v2351_v16 = vunpack.i.l.bf16 %v2350_v15 }
0x10a4   :  { %v1382_v7 = vsel %vm176_vm8, %v2941_v32, %v2351_v16  ;;  %v1664_v18 = vsel %vm176_vm8, %v1448_v6, %v2352_v9 }
0x10c1   :  { %v2360_v34 = vpop.permute.xlu1 %2359 }
0x10c2   :  { %v2362_v38 = vunpack.i.h.bf16 %v2360_v34  ;;  %v2361_v20 = vunpack.i.l.bf16 %v2360_v34  ;;  %v2314_v34 = vld [vmem:[%s3137_s13 + $0x78] sm:$0xff] }
0x10c3   :  { %1917 = vmatpush.bf16.msra.mxu0 %v2314_v34 }
0x10cc   :  { %v2355_v56 = vpop.permute.xlu0 %2354 }
0x10cd   :  { %v2357_v63 = vunpack.i.h.bf16 %v2355_v56  ;;  %v2356_v17 = vunpack.i.l.bf16 %v2355_v56  ;;  %v2313_v56 = vld [vmem:[%s3137_s13 + $0x70] sm:$0xff] }
0x10ce   :  { %1918 = vmatpush.bf16.msra.mxu0 %v2313_v56 }
0x10cf   :  { %v1665_v21 = vsel %vm454_vm10, %v1664_v18, %v2357_v63  ;;  %v1383_v22 = vsel %vm454_vm10, %v1382_v7, %v2356_v17  ;;  %v2312_v63 = vld [vmem:[%s3137_s13 + $0x68] sm:$0xff]  ;;  %v2311_v17 = vld [vmem:[%s3137_s13 + $0x60] sm:$0xff]  ;;  %v2310_v7 = vld [vmem:[%s3137_s13 + $0x58] sm:$0xff] }
0x10d0   :  { %v1384_v23 = vsel %vm456_vm11, %v1383_v22, %v2361_v20  ;;  %v1666_v24 = vsel %vm456_vm11, %v1665_v21, %v2362_v38  ;;  %v2377_v18 = vld [vmem:[%s3168_s20 + $0x1] ss:$0 sm:$0xff]  ;;  %v2309_v20 = vld [vmem:[%s3137_s13 + $0x50] sm:$0xff] }
0x10d1   :  { %v1672_v25 = vpack.c.bf16 %v1666_v24, %v1384_v23  ;;  %v2308_v23 = vld [vmem:[%s3137_s13 + $0x48] sm:$0xff] }
0x10d2   :  { %1919 = vmatpush.bf16.msra.mxu0 %v2312_v63 }
0x10d3   :  { %2208 = vmatmul.msk.bf16.vlgmr.msra.gmra.mxu1 %vm73_vm0, %v1672_v25 }
0x10d6   :  { %1920 = vmatpush.bf16.msra.mxu0 %v2311_v17 }
0x10da   :  { %1921 = vmatpush.bf16.msra.mxu0 %v2310_v7 }
0x10de   :  { %1922 = vmatpush.bf16.msra.mxu0 %v2309_v20 }
0x10e2   :  { %1923 = vmatpush.bf16.msra.mxu0 %v2308_v23 }
0x1150   :  { %v1697_v32 = vpop.f32.mrf.mxu1 }
0x1151   :  { %v1702_v27 = vadd.f32 %v1697_v32, %v2863_v8 }
0x1153   :  { %v3034_v28 = vadd.f32 %v2374_v26, %v1702_v27 }
0x1155   :  { %v1715_v29 = vsel %vm73_vm0, %v3034_v28, 0.0 }
0x1156   :  { %1716 = vadd.xlane.f32.xlu2 %v1715_v29 }
0x1158   :  { %v1699_v30 = vpop.f32.mrf.mxu1 }
0x1159   :  { %v1703_v31 = vadd.f32 %v1699_v30, %v2868_v12 }
0x115b   :  { %v3039_v57 = vadd.f32 %v2374_v26, %v1703_v31  ;;  %v2307_v26 = vld [vmem:[%s3137_s13 + $0x40] sm:$0xff] }
0x115c   :  { %1924 = vmatpush.bf16.msra.mxu0 %v2307_v26 }
0x115d   :  { %v1718_v33 = vsel %vm73_vm0, %v3039_v57, 0.0 }
0x115e   :  { %1719 = vadd.xlane.f32.xlu0 %v1718_v33 }
0x11c9   :  { %v1717_v35 = vpop.xlane.xlu2 %1716 }
0x11ca   :  { %v1721_v4 = vmul.f32 %v1717_v35, %v2637_v13 }
0x11cc   :  { %v1723_v8 = vsub.f32 %v3034_v28, %v1721_v4 }
0x11ce   :  { %v1725_v36 = vmul.f32 %v1723_v8, %v1723_v8 }
0x11d0   :  { %v1727_v37 = vsel %vm73_vm0, %v1725_v36, 0.0 }
0x11d1   :  { %1728 = vadd.xlane.f32.xlu1 %v1727_v37  ;;  %v1720_v39 = vpop.xlane.xlu0 %1719 }
0x11d2   :  { %v1722_v40 = vmul.f32 %v1720_v39, %v2637_v13 }
0x11d4   :  { %v1724_v12 = vsub.f32 %v3039_v57, %v1722_v40 }
0x11d6   :  { %v1726_v41 = vmul.f32 %v1724_v12, %v1724_v12 }
0x11d8   :  { %v1730_v3 = vsel %vm73_vm0, %v1726_v41, 0.0 }
0x11d9   :  { %1731 = vadd.xlane.f32.xlu2 %v1730_v3 }
0x1244   :  { %v1729_v43 = vpop.xlane.xlu1 %1728 }
0x1245   :  { %v1733_v44 = vmul.f32 %v1729_v43, %v2637_v13 }
0x1247   :  { %v1735_v5 = vadd.f32 1e-05, %v1733_v44 }
0x1249   :  { %2467 = vrsqrt.f32 %v1735_v5  ;;  %vm1743_vm9 = vweird.f32 %v1735_v5 }
0x124c   :  { %v1732_v46 = vpop.xlane.xlu2 %1731 }
0x124d   :  { %v1734_v47 = vmul.f32 %v1732_v46, %v2637_v13 }
0x124f   :  { %v2468_v48 = vpop.eup %2467  ;;  %v1736_v49 = vadd.f32 1e-05, %v1734_v47 }
0x1250   :  { %v1738_v50 = vmul.f32 %v2468_v48, %v1735_v5  ;;  %vm1744_vm8 = vweird.f32 %v2468_v48 }
0x1251   :  { %2469 = vrsqrt.f32 %v1736_v49  ;;  %vm1745_vm11 = vmor %vm1743_vm9, %vm1744_vm8  ;;  %vm1753_vm7 = vweird.f32 %v1736_v49 }
0x1252   :  { %v1739_v51 = vmul.f32 %v2468_v48, %v1738_v50 }
0x1254   :  { %v1740_v52 = vmul.f32 0.5, %v1739_v51 }
0x1256   :  { %v1741_v53 = vsub.f32 1.5, %v1740_v52 }
0x1257   :  { %v2470_v54 = vpop.eup %2469 }
0x1258   :  { %v1742_v59 = vmul.f32 %v2468_v48, %v1741_v53  ;;  %v1748_v55 = vmul.f32 %v2470_v54, %v1736_v49  ;;  %vm1754_vm6 = vweird.f32 %v2470_v54 }
0x1259   :  { %vm1755_vm12 = vmor %vm1753_vm7, %vm1754_vm6 }
0x125a   :  { %v1749_v60 = vmul.f32 %v2470_v54, %v1748_v55  ;;  %v1746_v19 = vsel %vm1745_vm11, %v2468_v48, %v1742_v59  ;;  %v2378_v59 = vld [vmem:[%s3138_s14 + $0x1] ss:$0 sm:$0xff] }
0x125b   :  { %v1757_v1 = vmul.f32 %v1746_v19, %v1723_v8 }
0x125c   :  { %v1750_v61 = vmul.f32 0.5, %v1749_v60 }
0x125d   :  { %v1762_v11 = vmul.f32 %v2375_v0, %v1757_v1 }
0x125e   :  { %v1751_v62 = vsub.f32 1.5, %v1750_v61 }
0x125f   :  { %v1767_v15 = vadd.f32 %v2376_v10, %v1762_v11 }
0x1260   :  { %v1752_v2 = vmul.f32 %v2470_v54, %v1751_v62 }
0x1262   :  { %v1756_v6 = vsel %vm1755_vm12, %v2470_v54, %v1752_v2 }
0x1263   :  { %v1758_v14 = vmul.f32 %v1756_v6, %v1724_v12 }
0x1265   :  { %v1763_v58 = vmul.f32 %v2375_v0, %v1758_v14 }
0x1267   :  { %v1768_v9 = vadd.f32 %v2376_v10, %v1763_v58 }
0x1269   :  { %v1774_v16 = vpack.c.bf16 %v1768_v9, %v1767_v15 }
0x126b   :  { %2225 = vmatmul.msk.bf16.vlgmr.msrb.gmra.mxu3 %vm73_vm0, %v1774_v16 }
0x12ee   :  { %v1804_v38 = vpop.f32.mrf.mxu3 }
0x12ef   :  { %v1805_v21 = vadd.f32 %v2377_v18, %v1804_v38 }
0x12f1   :  { %v2226_v22 = vmul.f32 -1.702, %v1805_v21 }
0x12f3   :  { %v1813_v24 = vmul.f32 1.442695, %v2226_v22 }
0x12f5   :  { %2471 = vpow2.f32 %v1813_v24 }
0x12f6   :  { %v1806_v25 = vpop.f32.mrf.mxu3 }
0x12f7   :  { %v1807_v32 = vadd.f32 %v2377_v18, %v1806_v25 }
0x12f9   :  { %v2227_v27 = vmul.f32 -1.702, %v1807_v32 }
0x12fb   :  { %v2472_v29 = vpop.eup %2471  ;;  %v1815_v30 = vmul.f32 1.442695, %v2227_v27 }
0x12fc   :  { %v1817_v31 = vadd.f32 1.0, %v2472_v29 }
0x12fd   :  { %2473 = vpow2.f32 %v1815_v30 }
0x12fe   :  { %2475 = vrcp.f32 %v1817_v31  ;;  %v1830_v41 = vand.u32 2147483648, %v1817_v31  ;;  %vm1824_vm14 = vweird.f32 %v1817_v31  ;;  %v1828_v3 = vand.u32 2147483647, %v1817_v31 }
0x1300   :  { %v1831_v46 = vor.u32 1.1754944e-38, %v1830_v41  ;;  %vm1829_vm2 = vcmp.eq.f32.partialorder %v1828_v3, 8.507059e+37  ;;  %v2316_v41 = vld [vmem:[%s3141_s17 + $0x8] sm:$0xff]  ;;  %v2315_v3 = vld [vmem:[%s3141_s17] sm:$0xff] }
0x1303   :  { %v2474_v33 = vpop.eup %2473 }
0x1304   :  { %v2476_v35 = vpop.eup %2475  ;;  %v1818_v4 = vadd.f32 1.0, %v2474_v33 }
0x1305   :  { %v1820_v8 = vmul.f32 %v2476_v35, %v1817_v31  ;;  %vm1825_vm13 = vweird.f32 %v2476_v35 }
0x1306   :  { %2477 = vrcp.f32 %v1818_v4  ;;  %vm1826_vm15 = vmor %vm1824_vm14, %vm1825_vm13  ;;  %v1845_v43 = vand.u32 2147483648, %v1818_v4  ;;  %v1843_v5 = vand.u32 2147483647, %v1818_v4  ;;  %vm1839_vm3 = vweird.f32 %v1818_v4 }
0x1307   :  { %v1821_v36 = vsub.f32 1.0, %v1820_v8  ;;  %vm2053_vm13 = vcmask 123904  }
0x1308   :  { %v1846_v49 = vor.u32 1.1754944e-38, %v1845_v43  ;;  %vm1844_vm5 = vcmp.eq.f32.partialorder %v1843_v5, 8.507059e+37 }
0x1309   :  { %v1822_v37 = vmul.f32 %v2476_v35, %v1821_v36  ;;  %v2380_v36 = vld [vmem:[%s3140_s16] ss:$0 sm:$0xff]  ;;  %s2524_s16 = smov [#allocation2]  }
0x130a   :  { %s2060_s29 = sshll.u32 %s2524_s16, 4  ;;  %s2061_s29 = int_to_ptr.vmem [resolvable:$true] %s2060_s29 }
0x130b   :  { %v1823_v40 = vadd.f32 %v2476_v35, %v1822_v37 }
0x130c   :  { %v2478_v39 = vpop.eup %2477 }
0x130d   :  { %v1835_v12 = vmul.f32 %v2478_v39, %v1818_v4  ;;  %v1827_v44 = vsel %vm1826_vm15, %v2476_v35, %v1823_v40  ;;  %vm1840_vm1 = vweird.f32 %v2478_v39 }
0x130e   :  { %v1832_v48 = vsel %vm1829_vm2, %v1831_v46, %v1827_v44  ;;  %vm1841_vm4 = vmor %vm1839_vm3, %vm1840_vm1 }
0x130f   :  { %v1836_v42 = vsub.f32 1.0, %v1835_v12  ;;  %v1849_v52 = vmul.f32 %v1832_v48, %v1805_v21  ;;  %v1996_v12 = vld [vmem:[%s3178_s3] sm:$0x3] }
0x1311   :  { %v1837_v45 = vmul.f32 %v2478_v39, %v1836_v42 }
0x1313   :  { %v1838_v47 = vadd.f32 %v2478_v39, %v1837_v45 }
0x1315   :  { %v1842_v50 = vsel %vm1841_vm4, %v2478_v39, %v1838_v47 }
0x1316   :  { %v1847_v51 = vsel %vm1844_vm5, %v1846_v49, %v1842_v50 }
0x1317   :  { %v1850_v53 = vmul.f32 %v1847_v51, %v1807_v32 }
0x1319   :  { %v1868_v54 = vpack.c.bf16 %v1850_v53, %v1849_v52 }
0x131b   :  { %1925 = vmatmul.bf16.vlgmr.msra.gmra.mxu0 %v1868_v54 }
0x1398   :  { %v1926_v55 = vpop.f32.mrf.mxu0 }
0x1399   :  { %v1931_v60 = vadd.f32 %v1926_v55, %v3034_v28 }
0x139b   :  { %v1938_v19 = vadd.f32 %v2378_v59, %v1931_v60 }
0x139d   :  { %v1942_v61 = vsel %vm73_vm0, %v1938_v19, 0.0 }
0x139e   :  { %1943 = vadd.xlane.f32.xlu1 %v1942_v61 }
0x13a0   :  { %v1928_v62 = vpop.f32.mrf.mxu0 }
0x13a1   :  { %v1932_v0 = vadd.f32 %v1928_v62, %v3039_v57 }
0x13a3   :  { %v1939_v1 = vadd.f32 %v2378_v59, %v1932_v0 }
0x13a5   :  { %v1945_v2 = vsel %vm73_vm0, %v1939_v1, 0.0 }
0x13a6   :  { %1946 = vadd.xlane.f32.xlu0 %v1945_v2 }
0x1411   :  { %v1944_v6 = vpop.xlane.xlu1 %1943 }
0x1412   :  { %v1948_v10 = vmul.f32 %v1944_v6, %v2637_v13 }
0x1414   :  { %v1950_v11 = vsub.f32 %v1938_v19, %v1948_v10 }
0x1416   :  { %v1952_v14 = vmul.f32 %v1950_v11, %v1950_v11 }
0x1418   :  { %v1954_v58 = vsel %vm73_vm0, %v1952_v14, 0.0 }
0x1419   :  { %1955 = vadd.xlane.f32.xlu0 %v1954_v58  ;;  %v1947_v28 = vpop.xlane.xlu0 %1946 }
0x141a   :  { %v1949_v15 = vmul.f32 %v1947_v28, %v2637_v13 }
0x141c   :  { %v1951_v9 = vsub.f32 %v1939_v1, %v1949_v15 }
0x141e   :  { %v1953_v16 = vmul.f32 %v1951_v9, %v1951_v9 }
0x1420   :  { %v1957_v34 = vsel %vm73_vm0, %v1953_v16, 0.0 }
0x1421   :  { %1958 = vadd.xlane.f32.xlu2 %v1957_v34 }
0x148c   :  { %v1956_v57 = vpop.xlane.xlu0 %1955 }
0x148d   :  { %v1960_v56 = vmul.f32 %v1956_v57, %v2637_v13 }
0x148f   :  { %v1962_v63 = vadd.f32 1e-05, %v1960_v56 }
0x1491   :  { %2479 = vrsqrt.f32 %v1962_v63  ;;  %vm1970_vm9 = vweird.f32 %v1962_v63 }
0x1494   :  { %v1959_v17 = vpop.xlane.xlu2 %1958 }
0x1495   :  { %v1961_v7 = vmul.f32 %v1959_v17, %v2637_v13  ;;  %v2379_v13 = vld [vmem:[%s3139_s15] ss:$0 sm:$0xff] }
0x1497   :  { %v2480_v18 = vpop.eup %2479  ;;  %v1963_v38 = vadd.f32 1e-05, %v1961_v7 }
0x1498   :  { %v1965_v20 = vmul.f32 %v2480_v18, %v1962_v63  ;;  %vm1971_vm8 = vweird.f32 %v2480_v18 }
0x1499   :  { %2481 = vrsqrt.f32 %v1963_v38  ;;  %vm1972_vm11 = vmor %vm1970_vm9, %vm1971_vm8  ;;  %vm1980_vm7 = vweird.f32 %v1963_v38 }
0x149a   :  { %v1966_v21 = vmul.f32 %v2480_v18, %v1965_v20 }
0x149c   :  { %v1967_v22 = vmul.f32 0.5, %v1966_v21 }
0x149e   :  { %v1968_v23 = vsub.f32 1.5, %v1967_v22 }
0x149f   :  { %v2482_v24 = vpop.eup %2481 }
0x14a0   :  { %v1975_v25 = vmul.f32 %v2482_v24, %v1963_v38  ;;  %v1969_v26 = vmul.f32 %v2480_v18, %v1968_v23  ;;  %vm1981_vm6 = vweird.f32 %v2482_v24 }
0x14a1   :  { %vm1982_vm12 = vmor %vm1980_vm7, %vm1981_vm6 }
0x14a2   :  { %v1976_v32 = vmul.f32 %v2482_v24, %v1975_v25  ;;  %v1973_v29 = vsel %vm1972_vm11, %v2480_v18, %v1969_v26 }
0x14a3   :  { %v1984_v33 = vmul.f32 %v1973_v29, %v1950_v11 }
0x14a4   :  { %v1977_v27 = vmul.f32 0.5, %v1976_v32 }
0x14a5   :  { %v1989_v37 = vmul.f32 %v2379_v13, %v1984_v33 }
0x14a6   :  { %v1978_v30 = vsub.f32 1.5, %v1977_v27 }
0x14a7   :  { %v1994_v40 = vadd.f32 %v2380_v36, %v1989_v37 }
0x14a8   :  { %v1979_v31 = vmul.f32 %v2482_v24, %v1978_v30 }
0x14aa   :  { %v1983_v35 = vsel %vm1982_vm12, %v2482_v24, %v1979_v31 }
0x14ab   :  { %v1985_v4 = vmul.f32 %v1983_v35, %v1951_v9 }
0x14ad   :  { %v1990_v8 = vmul.f32 %v2379_v13, %v1985_v4 }
0x14af   :  { %v1995_v39 = vadd.f32 %v2380_v36, %v1990_v8 }
0x14b1   :  { %2014 = vmatpush.msra.mxu2 %v1995_v39 }
0x14b3   :  { %2015 = vmatpush.msra.mxu2 %v1994_v40 }
0x14b4   :  { %2277 = vmatmul.msk.f32.vlgmr.msra.gmra.mxu2 %vm454_vm10, %v1996_v12 }
0x14b5   :  { %2046 = vmatpush.bf16.msrb.mxu2 %v2316_v41 }
0x14b9   :  { %2047 = vmatpush.bf16.msrb.mxu2 %v2315_v3 }
0x1537   :  { %v2017_v42 = vpop.f32.mrf.mxu2 }
0x1538   :  { %v2024_v43 = vpack.c.bf16 %v2017_v42, %v2017_v42 }
0x153a   :  { %2286 = vmatmul.msk.bf16.vlgmr.msrb.gmra.mxu2 %vm73_vm0, %v2024_v43 }
0x15bd   :  { %v2049_v44 = vpop.f32.mrf.mxu2 }
0x15be   :  { %2054 = vst.msk [vmem:[#allocation2] sm:$0x3] %vm2053_vm13, %v2049_v44 }
0x15bf   :  { %2065 = dma.vmem_to_hbm [thread:$0]  %s2061_s29, 32, %s2063_s23, [#allocation3]  }
0x15c5   :  { %v2051_v45 = vpop.f32.mrf.mxu2 }
0x15c6   :  { %2507 = dma.done.wait [#allocation3], 32  }
0x15c7   :  { %2508 = vsyncadd [#allocation3], 4294967264 }
0x15c8   :  { %2070 = vsyncpa [#allocation3], 1 }

</bundles_post_ra>
